<compile_context>
chip_gen: v7x
topology: tpu7x:2x2x1
jax: 0.10.0
libtpu: 0.0.40
codegen_flags: <defaults>
</compile_context>

<pallas_src>
import functools

import jax
import jax.numpy as jnp
from jax.experimental import pallas as pl
from jax.experimental.pallas import tpu as pltpu


VMEM_LIMIT_BYTES = 32 * 1024 * 1024   # <= physical/scoped VMEM on v5e/v6e/v7x


def _round_up(x, m):
    return ((x + m - 1) // m) * m


# ----------------------------------------------------------------------------
# Pallas kernels
# ----------------------------------------------------------------------------
def _gemm_bias_act_kernel(x_ref, w_ref, b_ref, o_ref, *, relu):
    """One M-tile of y = x @ w + b (optional ReLU). bf16 operands, f32 accum."""
    acc = jnp.dot(x_ref[...], w_ref[...], preferred_element_type=jnp.float32)
    acc = acc + b_ref[...]                      # (1, N) broadcasts over rows
    if relu:
        acc = jnp.maximum(acc, 0.0)
    o_ref[...] = acc.astype(o_ref.dtype)


def gemm_bias_act(x, w, b, relu=False, out_dtype=jnp.float32, tm_max=256):
    """y = x @ w + b, optionally ReLU.  x:(M,K) w:(K,N) b:(N,) -> (M,N).

    Tiled over M (8-aligned, zero-padded) with a parallel grid so row tiles
    are pipelined / megacore-sharded; weights stay resident per tile.
    """
    M, K = x.shape
    K2, Nout = w.shape
    assert K == K2
    tm = min(tm_max, _round_up(M, 8))
    Mp = _round_up(M, tm)
    x = x.astype(jnp.bfloat16)
    if Mp != M:
        x = jnp.pad(x, ((0, Mp - M), (0, 0)))
    y = pl.pallas_call(
        functools.partial(_gemm_bias_act_kernel, relu=relu),
        out_shape=jax.ShapeDtypeStruct((Mp, Nout), out_dtype),
        grid=(Mp // tm,),
        in_specs=[
            pl.BlockSpec((tm, K), lambda i: (i, 0)),
            pl.BlockSpec((K, Nout), lambda i: (0, 0)),
            pl.BlockSpec((1, Nout), lambda i: (0, 0)),
        ],
        out_specs=pl.BlockSpec((tm, Nout), lambda i: (i, 0)),
        compiler_params=pltpu.CompilerParams(
            dimension_semantics=("parallel",),
            vmem_limit_bytes=VMEM_LIMIT_BYTES,
        ),
    )(x, w.astype(jnp.bfloat16), b.reshape(1, Nout).astype(jnp.float32))
    return y[:M] if Mp != M else y
    # TODO(synk): repack conv output tiles to a lane-dense (rows, OW*Cout) layout
    # to avoid masked sub-128-lane stores.


def _head_kernel(xf_ref, g_ref, h_ref, m_ref,
                 fcw_ref, fcb_ref,
                 wif_ref, wig_ref, whh_ref, bi_ref, bh_ref,
                 wc_ref, bc_ref,
                 v_ref, h_out_ref):
    """Fused: fc(+ReLU) -> GRU cell (concat as two dots, per-gate weights)
    -> critic value (VPU reduction).  PyTorch gate order r, z, n."""
    # FC: feat = relu(x_flat @ fc_w + fc_b)        (bf16 operands, f32 accum)
    feat = jnp.dot(xf_ref[...], fcw_ref[...], preferred_element_type=jnp.float32)
    feat = jnp.maximum(feat + fcb_ref[...], 0.0)                 # (tb, H) f32
    feat_b = feat.astype(jnp.bfloat16)
    goal_b = g_ref[...].astype(jnp.bfloat16)                     # (tb, G)

    # GRU: h is masked (hidden_states * masks); recurrent state kept in f32.
    h = h_ref[...] * m_ref[...]                                  # (tb, H) f32
    h_b = h.astype(jnp.bfloat16)

    def gate_i(idx):   # W_i? @ [feat, goal] + b_i?   (concat as two dots)
        return (jnp.dot(feat_b, wif_ref[idx], preferred_element_type=jnp.float32)
                + jnp.dot(goal_b, wig_ref[idx], preferred_element_type=jnp.float32)
                + bi_ref[idx])

    def gate_h(idx):   # W_h? @ h + b_h?
        return jnp.dot(h_b, whh_ref[idx], preferred_element_type=jnp.float32) + bh_ref[idx]

    r = jax.nn.sigmoid(gate_i(0) + gate_h(0))
    z = jax.nn.sigmoid(gate_i(1) + gate_h(1))
    n = jnp.tanh(gate_i(2) + r * gate_h(2))       # b_hn stays inside r*(...)
    h_new = (1.0 - z) * n + z * h
    h_out_ref[...] = h_new.astype(h_out_ref.dtype)

    # Critic: (H,1) matmul replaced by a VPU reduction.
    v = jnp.sum(h_new * wc_ref[...], axis=-1, keepdims=True) + bc_ref[...]
    v_ref[...] = v.astype(v_ref.dtype)


def head_fused(x_flat, goal, h, masks, params, hidden):
    """Runs fc + GRU(single step) + critic in one pallas_call, tiled over rows."""
    N, F = x_flat.shape
    G = goal.shape[1]
    H = hidden
    tb = min(256, _round_up(N, 8))
    Np = _round_up(N, tb)
    pad = Np - N
    if pad:
        x_flat = jnp.pad(x_flat, ((0, pad), (0, 0)))
        goal = jnp.pad(goal, ((0, pad), (0, 0)))
        h = jnp.pad(h, ((0, pad), (0, 0)))
        masks = jnp.pad(masks, ((0, pad), (0, 0)))

    value, h_new = pl.pallas_call(
        _head_kernel,
        out_shape=(
            jax.ShapeDtypeStruct((Np, 1), jnp.float32),
            jax.ShapeDtypeStruct((Np, H), jnp.float32),
        ),
        grid=(Np // tb,),
        in_specs=[
            pl.BlockSpec((tb, F), lambda i: (i, 0)),      # x_flat
            pl.BlockSpec((tb, G), lambda i: (i, 0)),      # pointgoal
            pl.BlockSpec((tb, H), lambda i: (i, 0)),      # hidden state
            pl.BlockSpec((tb, 1), lambda i: (i, 0)),      # masks
            pl.BlockSpec((F, H), lambda i: (0, 0)),       # fc_w
            pl.BlockSpec((1, H), lambda i: (0, 0)),       # fc_b
            pl.BlockSpec((3, H, H), lambda i: (0, 0, 0)),  # W_i (feat part), per gate
            pl.BlockSpec((3, G, H), lambda i: (0, 0, 0)),  # W_i (goal part), per gate
            pl.BlockSpec((3, H, H), lambda i: (0, 0, 0)),  # W_h, per gate
            pl.BlockSpec((3, 1, H), lambda i: (0, 0, 0)),  # b_i, per gate
            pl.BlockSpec((3, 1, H), lambda i: (0, 0, 0)),  # b_h, per gate
            pl.BlockSpec((1, H), lambda i: (0, 0)),        # critic weight row
            pl.BlockSpec((1, 1), lambda i: (0, 0)),        # critic bias
        ],
        out_specs=(
            pl.BlockSpec((tb, 1), lambda i: (i, 0)),
            pl.BlockSpec((tb, H), lambda i: (i, 0)),
        ),
        compiler_params=pltpu.CompilerParams(
            dimension_semantics=("parallel",),
            vmem_limit_bytes=VMEM_LIMIT_BYTES,
        ),
    )(x_flat.astype(jnp.bfloat16), goal.astype(jnp.float32),
      h.astype(jnp.float32), masks.astype(jnp.float32),
      params["fc_w"], params["fc_b"].reshape(1, H),
      params["gru_wif"], params["gru_wig"], params["gru_whh"],
      params["gru_bi"], params["gru_bh"],
      params["critic_w"], params["critic_b"])
    if pad:
        value, h_new = value[:N], h_new[:N]
    return value, h_new


# ----------------------------------------------------------------------------
# Glue (im2col patch extraction, parameter init, full forward)
# ----------------------------------------------------------------------------
def im2col(x, k, s):
    """x: (N, H, W, C) NHWC -> (N*OH*OW, k*k*C) patches, plus OH, OW."""
    N, H, W, C = x.shape
    OH = (H - k) // s + 1
    OW = (W - k) // s + 1
    cols = []
    for i in range(k):
        for j in range(k):
            cols.append(x[:, i:i + s * OH:s, j:j + s * OW:s, :])  # (N,OH,OW,C)
    p = jnp.stack(cols, axis=3)                                   # (N,OH,OW,k*k,C)
    return p.reshape(N * OH * OW, k * k * C), OH, OW


def conv_out_dim(d, k, s):
    return (d - k) // s + 1


def init_params(key, depth_c, goal_dim, hidden, img_hw):
    """Deterministic orthogonal init (mirrors layer_init; biases = 0).

    Matmul weights stored in bf16 (MXU operands); biases / critic row in f32.
    Conv weight rows are in (kh, kw, cin) order and fc_w rows in NHWC-flatten
    (oh, ow, c) order; a torch-imported weight would need the corresponding
    row permutations.
    """
    h = w = img_hw
    for k, s in zip((8, 4, 3), (4, 2, 1)):
        h, w = conv_out_dim(h, k, s), conv_out_dim(w, k, s)
    flat = 32 * h * w
    ks = jax.random.split(key, 8)
    orth_relu = jax.nn.initializers.orthogonal(scale=2.0 ** 0.5)
    orth = jax.nn.initializers.orthogonal(scale=1.0)
    f32, bf16 = jnp.float32, jnp.bfloat16
    H, G = hidden, goal_dim

    # GRU weights initialized as full orthogonal matrices, then split per gate
    # (r, z, n) and per input part (feat rows / goal rows) to keep the kernel
    # free of sub-128-lane column slicing.
    w_ih = orth(ks[4], (H + G, 3 * H), f32)     # rows: [feat(H); goal(G)]
    w_hh = orth(ks[5], (H, 3 * H), f32)
    gru_wif = jnp.stack([w_ih[:H, g * H:(g + 1) * H] for g in range(3)]).astype(bf16)
    gru_wig = jnp.stack([w_ih[H:, g * H:(g + 1) * H] for g in range(3)]).astype(bf16)
    gru_whh = jnp.stack([w_hh[:, g * H:(g + 1) * H] for g in range(3)]).astype(bf16)

    params = {
        "conv1_w": orth_relu(ks[0], (8 * 8 * depth_c, 32), f32).astype(bf16),
        "conv1_b": jnp.zeros((32,), f32),
        "conv2_w": orth_relu(ks[1], (4 * 4 * 32, 64), f32).astype(bf16),
        "conv2_b": jnp.zeros((64,), f32),
        "conv3_w": orth_relu(ks[2], (3 * 3 * 64, 32), f32).astype(bf16),
        "conv3_b": jnp.zeros((32,), f32),
        "fc_w": orth_relu(ks[3], (flat, hidden), f32).astype(bf16),
        "fc_b": jnp.zeros((hidden,), f32),
        "gru_wif": gru_wif,                     # (3, H, H)
        "gru_wig": gru_wig,                     # (3, G, H)
        "gru_whh": gru_whh,                     # (3, H, H)
        "gru_bi": jnp.zeros((3, 1, hidden), f32),
        "gru_bh": jnp.zeros((3, 1, hidden), f32),
        "critic_w": orth(ks[6], (hidden, 1), f32).reshape(1, hidden),
        "critic_b": jnp.zeros((1, 1), f32),
    }
    return params


@functools.partial(jax.jit, static_argnames=("hidden",))
def net_forward(params, depth, pointgoal, rnn_hidden_states, masks, hidden):
    """Mirrors Net.forward for the depth-only, single-step (x.size(0)==h.size(0)) path.

    depth:      (N, H, W, Cd)  float32  (NHWC observation, as in habitat)
    pointgoal:  (N, goal_dim)
    rnn_hidden: (N, hidden)
    masks:      (N, 1)
    returns (critic_value (N,1), x (N,hidden), rnn_hidden_states (N,hidden))
    """
    N = depth.shape[0]
    x = depth.astype(jnp.bfloat16)              # bf16 activations halve im2col DMA
    conv_cfg = [
        (params["conv1_w"], params["conv1_b"], 8, 4, True),
        (params["conv2_w"], params["conv2_b"], 4, 2, True),
        (params["conv3_w"], params["conv3_b"], 3, 1, False),
    ]
    for wmat, b, k, s, relu in conv_cfg:
        cols, OH, OW = im2col(x, k, s)
        y = gemm_bias_act(cols, wmat, b, relu=relu, out_dtype=jnp.bfloat16)
        x = y.reshape(N, OH, OW, wmat.shape[1])
    # NHWC flatten: free reshape, no runtime transpose (fc_w rows match this order).
    x_flat = x.reshape(N, -1)
    value, h_new = head_fused(x_flat, pointgoal, rnn_hidden_states, masks,
                              params, hidden)
    # For a single-layer, single-step GRU the sequence output equals the new hidden.
    return value, h_new, h_new
    # TODO(synk): the multi-step forward_rnn path (x.size(0) != hidden.size(0)) with
    # mask-driven segment splitting is host control flow and is not implemented here.


if __name__ == "__main__":
    batch = 2
    img_hw = 64          # smallest-ish spatial size that survives kernels (8,4,3)/(4,2,1)
    depth_c = 1          # observation_space['depth'].shape[2]
    goal_dim = 2         # observation_space['pointgoal'].shape[0]
    hidden = 32

    key = jax.random.PRNGKey(0)
    k_depth, k_goal, k_h, k_param = jax.random.split(key, 4)
    depth = jax.random.uniform(k_depth, (batch, img_hw, img_hw, depth_c), jnp.float32)
    pointgoal = jax.random.normal(k_goal, (batch, goal_dim), jnp.float32)
    rnn_hidden = jax.random.normal(k_h, (batch, hidden), jnp.float32)
    masks = jnp.ones((batch, 1), jnp.float32)

    params = init_params(k_param, depth_c, goal_dim, hidden, img_hw)

    value, x_out, h_out = net_forward(params, depth, pointgoal, rnn_hidden, masks, hidden)
    jax.block_until_ready((value, x_out, h_out))

    assert value.shape == (batch, 1)
    assert x_out.shape == (batch, hidden)
    assert h_out.shape == (batch, hidden)
    print("KERNEL_OK")
</pallas_src>

<mosaic_0001>
module attributes {stable_mosaic.version = 11 : i64} {
  func.func @_gemm_bias_act_kernel(%arg0: i32, %arg1: memref<256x64xbf16, #tpu.memory_space<vmem>>, %arg2: memref<64x32xbf16, #tpu.memory_space<vmem>>, %arg3: memref<1x32xf32, #tpu.memory_space<vmem>>, %arg4: memref<256x32xbf16, #tpu.memory_space<vmem>>) attributes {dimension_semantics = [#tpu.dimension_semantics<parallel>], iteration_bounds = array<i64: 2>, scalar_prefetch = 0 : i64, scratch_operands = 0 : i64, tpu.core_type = #tpu.core_type<tc>, window_params = [{transform_indices = @transform_0, window_bounds = array<i64: 256, 64>}, {pipeline_mode = #tpu.pipeline_mode<synchronous>, transform_indices = @transform_1, window_bounds = array<i64: 64, 32>}, {pipeline_mode = #tpu.pipeline_mode<synchronous>, transform_indices = @transform_2, window_bounds = array<i64: 1, 32>}, {transform_indices = @transform_3, window_bounds = array<i64: 256, 32>}]} {
    %c0 = arith.constant 0 : index
    %c0_0 = arith.constant 0 : index
    %0 = vector.load %arg1[%c0, %c0_0] : memref<256x64xbf16, #tpu.memory_space<vmem>>, vector<256x64xbf16>
    %c0_1 = arith.constant 0 : index
    %c0_2 = arith.constant 0 : index
    %1 = vector.load %arg2[%c0_1, %c0_2] : memref<64x32xbf16, #tpu.memory_space<vmem>>, vector<64x32xbf16>
    %cst = arith.constant dense<0.000000e+00> : vector<256x32xf32>
    %2 = tpu.matmul %0, %1, %cst {dimension_numbers = #tpu.dot_dimension_numbers<[1], [0], [0], [1], [0, 0, 1, 1], [], []>} : vector<256x64xbf16>, vector<64x32xbf16>, vector<256x32xf32> -> vector<256x32xf32>
    %c0_3 = arith.constant 0 : index
    %c0_4 = arith.constant 0 : index
    %3 = vector.load %arg3[%c0_3, %c0_4] : memref<1x32xf32, #tpu.memory_space<vmem>>, vector<1x32xf32>
    %4 = vector.broadcast %3 : vector<1x32xf32> to vector<256x32xf32>
    %5 = arith.addf %2, %4 : vector<256x32xf32>
    %cst_5 = arith.constant 0.000000e+00 : f32
    %6 = vector.broadcast %cst_5 : f32 to vector<256x32xf32>
    %7 = arith.maximumf %5, %6 : vector<256x32xf32>
    %8 = arith.truncf %7 : vector<256x32xf32> to vector<256x32xbf16>
    %c0_6 = arith.constant 0 : index
    %c0_7 = arith.constant 0 : index
    %9 = vector.load %arg4[%c0_6, %c0_7] : memref<256x32xbf16, #tpu.memory_space<vmem>>, vector<256x32xbf16>
    tpu.vector_store %arg4[%c0_6, %c0_7], %8 {strides = array<i32>} : memref<256x32xbf16, #tpu.memory_space<vmem>>, vector<256x32xbf16>,
    return
  }
  func.func @transform_0(%arg0: i32) -> (i32, i32) {
    %c0_i32 = arith.constant 0 : i32
    %c0_i32_0 = arith.constant 0 : i32
    return %arg0, %c0_i32 : i32, i32
  }
  func.func @transform_1(%arg0: i32) -> (i32, i32) {
    %c0_i32 = arith.constant 0 : i32
    %c0_i32_0 = arith.constant 0 : i32
    %c0_i32_1 = arith.constant 0 : i32
    return %c0_i32, %c0_i32_0 : i32, i32
  }
  func.func @transform_2(%arg0: i32) -> (i32, i32) {
    %c0_i32 = arith.constant 0 : i32
    %c0_i32_0 = arith.constant 0 : i32
    %c0_i32_1 = arith.constant 0 : i32
    return %c0_i32, %c0_i32_0 : i32, i32
  }
  func.func @transform_3(%arg0: i32) -> (i32, i32) {
    %c0_i32 = arith.constant 0 : i32
    %c0_i32_0 = arith.constant 0 : i32
    return %arg0, %c0_i32 : i32, i32
  }
}

module attributes {stable_mosaic.version = 11 : i64} {
  func.func @_gemm_bias_act_kernel(%arg0: i32, %arg1: memref<72x512xbf16, #tpu.memory_space<vmem>>, %arg2: memref<512x64xbf16, #tpu.memory_space<vmem>>, %arg3: memref<1x64xf32, #tpu.memory_space<vmem>>, %arg4: memref<72x64xbf16, #tpu.memory_space<vmem>>) attributes {dimension_semantics = [#tpu.dimension_semantics<parallel>], iteration_bounds = array<i64: 1>, scalar_prefetch = 0 : i64, scratch_operands = 0 : i64, tpu.core_type = #tpu.core_type<tc>, window_params = [{transform_indices = @transform_0, window_bounds = array<i64: 72, 512>}, {pipeline_mode = #tpu.pipeline_mode<synchronous>, transform_indices = @transform_1, window_bounds = array<i64: 512, 64>}, {pipeline_mode = #tpu.pipeline_mode<synchronous>, transform_indices = @transform_2, window_bounds = array<i64: 1, 64>}, {transform_indices = @transform_3, window_bounds = array<i64: 72, 64>}]} {
    %c0 = arith.constant 0 : index
    %c0_0 = arith.constant 0 : index
    %0 = vector.load %arg1[%c0, %c0_0] : memref<72x512xbf16, #tpu.memory_space<vmem>>, vector<72x512xbf16>
    %c0_1 = arith.constant 0 : index
    %c0_2 = arith.constant 0 : index
    %1 = vector.load %arg2[%c0_1, %c0_2] : memref<512x64xbf16, #tpu.memory_space<vmem>>, vector<512x64xbf16>
    %cst = arith.constant dense<0.000000e+00> : vector<72x64xf32>
    %2 = tpu.matmul %0, %1, %cst {dimension_numbers = #tpu.dot_dimension_numbers<[1], [0], [0], [1], [0, 0, 1, 1], [], []>} : vector<72x512xbf16>, vector<512x64xbf16>, vector<72x64xf32> -> vector<72x64xf32>
    %c0_3 = arith.constant 0 : index
    %c0_4 = arith.constant 0 : index
    %3 = vector.load %arg3[%c0_3, %c0_4] : memref<1x64xf32, #tpu.memory_space<vmem>>, vector<1x64xf32>
    %4 = vector.broadcast %3 : vector<1x64xf32> to vector<72x64xf32>
    %5 = arith.addf %2, %4 : vector<72x64xf32>
    %cst_5 = arith.constant 0.000000e+00 : f32
    %6 = vector.broadcast %cst_5 : f32 to vector<72x64xf32>
    %7 = arith.maximumf %5, %6 : vector<72x64xf32>
    %8 = arith.truncf %7 : vector<72x64xf32> to vector<72x64xbf16>
    %c0_6 = arith.constant 0 : index
    %c0_7 = arith.constant 0 : index
    %9 = vector.load %arg4[%c0_6, %c0_7] : memref<72x64xbf16, #tpu.memory_space<vmem>>, vector<72x64xbf16>
    tpu.vector_store %arg4[%c0_6, %c0_7], %8 {strides = array<i32>} : memref<72x64xbf16, #tpu.memory_space<vmem>>, vector<72x64xbf16>,
    return
  }
  func.func @transform_0(%arg0: i32) -> (i32, i32) {
    %c0_i32 = arith.constant 0 : i32
    %c0_i32_0 = arith.constant 0 : i32
    return %arg0, %c0_i32 : i32, i32
  }
  func.func @transform_1(%arg0: i32) -> (i32, i32) {
    %c0_i32 = arith.constant 0 : i32
    %c0_i32_0 = arith.constant 0 : i32
    %c0_i32_1 = arith.constant 0 : i32
    return %c0_i32, %c0_i32_0 : i32, i32
  }
  func.func @transform_2(%arg0: i32) -> (i32, i32) {
    %c0_i32 = arith.constant 0 : i32
    %c0_i32_0 = arith.constant 0 : i32
    %c0_i32_1 = arith.constant 0 : i32
    return %c0_i32, %c0_i32_0 : i32, i32
  }
  func.func @transform_3(%arg0: i32) -> (i32, i32) {
    %c0_i32 = arith.constant 0 : i32
    %c0_i32_0 = arith.constant 0 : i32
    return %arg0, %c0_i32 : i32, i32
  }
}

module attributes {stable_mosaic.version = 11 : i64} {
  func.func @_gemm_bias_act_kernel(%arg0: i32, %arg1: memref<32x576xbf16, #tpu.memory_space<vmem>>, %arg2: memref<576x32xbf16, #tpu.memory_space<vmem>>, %arg3: memref<1x32xf32, #tpu.memory_space<vmem>>, %arg4: memref<32x32xbf16, #tpu.memory_space<vmem>>) attributes {dimension_semantics = [#tpu.dimension_semantics<parallel>], iteration_bounds = array<i64: 1>, scalar_prefetch = 0 : i64, scratch_operands = 0 : i64, tpu.core_type = #tpu.core_type<tc>, window_params = [{transform_indices = @transform_0, window_bounds = array<i64: 32, 576>}, {pipeline_mode = #tpu.pipeline_mode<synchronous>, transform_indices = @transform_1, window_bounds = array<i64: 576, 32>}, {pipeline_mode = #tpu.pipeline_mode<synchronous>, transform_indices = @transform_2, window_bounds = array<i64: 1, 32>}, {transform_indices = @transform_3, window_bounds = array<i64: 32, 32>}]} {
    %c0 = arith.constant 0 : index
    %c0_0 = arith.constant 0 : index
    %0 = vector.load %arg1[%c0, %c0_0] : memref<32x576xbf16, #tpu.memory_space<vmem>>, vector<32x576xbf16>
    %c0_1 = arith.constant 0 : index
    %c0_2 = arith.constant 0 : index
    %1 = vector.load %arg2[%c0_1, %c0_2] : memref<576x32xbf16, #tpu.memory_space<vmem>>, vector<576x32xbf16>
    %cst = arith.constant dense<0.000000e+00> : vector<32x32xf32>
    %2 = tpu.matmul %0, %1, %cst {dimension_numbers = #tpu.dot_dimension_numbers<[1], [0], [0], [1], [0, 0, 1, 1], [], []>} : vector<32x576xbf16>, vector<576x32xbf16>, vector<32x32xf32> -> vector<32x32xf32>
    %c0_3 = arith.constant 0 : index
    %c0_4 = arith.constant 0 : index
    %3 = vector.load %arg3[%c0_3, %c0_4] : memref<1x32xf32, #tpu.memory_space<vmem>>, vector<1x32xf32>
    %4 = vector.broadcast %3 : vector<1x32xf32> to vector<32x32xf32>
    %5 = arith.addf %2, %4 : vector<32x32xf32>
    %6 = arith.truncf %5 : vector<32x32xf32> to vector<32x32xbf16>
    %c0_5 = arith.constant 0 : index
    %c0_6 = arith.constant 0 : index
    %7 = vector.load %arg4[%c0_5, %c0_6] : memref<32x32xbf16, #tpu.memory_space<vmem>>, vector<32x32xbf16>
    tpu.vector_store %arg4[%c0_5, %c0_6], %6 {strides = array<i32>} : memref<32x32xbf16, #tpu.memory_space<vmem>>, vector<32x32xbf16>,
    return
  }
  func.func @transform_0(%arg0: i32) -> (i32, i32) {
    %c0_i32 = arith.constant 0 : i32
    %c0_i32_0 = arith.constant 0 : i32
    return %arg0, %c0_i32 : i32, i32
  }
  func.func @transform_1(%arg0: i32) -> (i32, i32) {
    %c0_i32 = arith.constant 0 : i32
    %c0_i32_0 = arith.constant 0 : i32
    %c0_i32_1 = arith.constant 0 : i32
    return %c0_i32, %c0_i32_0 : i32, i32
  }
  func.func @transform_2(%arg0: i32) -> (i32, i32) {
    %c0_i32 = arith.constant 0 : i32
    %c0_i32_0 = arith.constant 0 : i32
    %c0_i32_1 = arith.constant 0 : i32
    return %c0_i32, %c0_i32_0 : i32, i32
  }
  func.func @transform_3(%arg0: i32) -> (i32, i32) {
    %c0_i32 = arith.constant 0 : i32
    %c0_i32_0 = arith.constant 0 : i32
    return %arg0, %c0_i32 : i32, i32
  }
}

module attributes {stable_mosaic.version = 11 : i64} {
  func.func @_head_kernel(%arg0: i32, %arg1: memref<8x512xbf16, #tpu.memory_space<vmem>>, %arg2: memref<8x2xf32, #tpu.memory_space<vmem>>, %arg3: memref<8x32xf32, #tpu.memory_space<vmem>>, %arg4: memref<8x1xf32, #tpu.memory_space<vmem>>, %arg5: memref<512x32xbf16, #tpu.memory_space<vmem>>, %arg6: memref<1x32xf32, #tpu.memory_space<vmem>>, %arg7: memref<3x32x32xbf16, #tpu.memory_space<vmem>>, %arg8: memref<3x2x32xbf16, #tpu.memory_space<vmem>>, %arg9: memref<3x32x32xbf16, #tpu.memory_space<vmem>>, %arg10: memref<3x1x32xf32, #tpu.memory_space<vmem>>, %arg11: memref<3x1x32xf32, #tpu.memory_space<vmem>>, %arg12: memref<1x32xf32, #tpu.memory_space<vmem>>, %arg13: memref<1x1xf32, #tpu.memory_space<vmem>>, %arg14: memref<8x1xf32, #tpu.memory_space<vmem>>, %arg15: memref<8x32xf32, #tpu.memory_space<vmem>>) attributes {dimension_semantics = [#tpu.dimension_semantics<parallel>], iteration_bounds = array<i64: 1>, scalar_prefetch = 0 : i64, scratch_operands = 0 : i64, tpu.core_type = #tpu.core_type<tc>, window_params = [{transform_indices = @transform_0, window_bounds = array<i64: 8, 512>}, {transform_indices = @transform_1, window_bounds = array<i64: 8, 2>}, {transform_indices = @transform_2, window_bounds = array<i64: 8, 32>}, {transform_indices = @transform_3, window_bounds = array<i64: 8, 1>}, {pipeline_mode = #tpu.pipeline_mode<synchronous>, transform_indices = @transform_4, window_bounds = array<i64: 512, 32>}, {pipeline_mode = #tpu.pipeline_mode<synchronous>, transform_indices = @transform_5, window_bounds = array<i64: 1, 32>}, {pipeline_mode = #tpu.pipeline_mode<synchronous>, transform_indices = @transform_6, window_bounds = array<i64: 3, 32, 32>}, {pipeline_mode = #tpu.pipeline_mode<synchronous>, transform_indices = @transform_7, window_bounds = array<i64: 3, 2, 32>}, {pipeline_mode = #tpu.pipeline_mode<synchronous>, transform_indices = @transform_8, window_bounds = array<i64: 3, 32, 32>}, {pipeline_mode = #tpu.pipeline_mode<synchronous>, transform_indices = @transform_9, window_bounds = array<i64: 3, 1, 32>}, {pipeline_mode = #tpu.pipeline_mode<synchronous>, transform_indices = @transform_10, window_bounds = array<i64: 3, 1, 32>}, {pipeline_mode = #tpu.pipeline_mode<synchronous>, transform_indices = @transform_11, window_bounds = array<i64: 1, 32>}, {pipeline_mode = #tpu.pipeline_mode<synchronous>, transform_indices = @transform_12, window_bounds = array<i64: 1, 1>}, {transform_indices = @transform_13, window_bounds = array<i64: 8, 1>}, {transform_indices = @transform_14, window_bounds = array<i64: 8, 32>}]} {
    %c0 = arith.constant 0 : index
    %c0_0 = arith.constant 0 : index
    %0 = vector.load %arg1[%c0, %c0_0] : memref<8x512xbf16, #tpu.memory_space<vmem>>, vector<8x512xbf16>
    %c0_1 = arith.constant 0 : index
    %c0_2 = arith.constant 0 : index
    %1 = vector.load %arg5[%c0_1, %c0_2] : memref<512x32xbf16, #tpu.memory_space<vmem>>, vector<512x32xbf16>
    %cst = arith.constant dense<0.000000e+00> : vector<8x32xf32>
    %2 = tpu.matmul %0, %1, %cst {dimension_numbers = #tpu.dot_dimension_numbers<[1], [0], [0], [1], [0, 0, 1, 1], [], []>} : vector<8x512xbf16>, vector<512x32xbf16>, vector<8x32xf32> -> vector<8x32xf32>
    %c0_3 = arith.constant 0 : index
    %c0_4 = arith.constant 0 : index
    %3 = vector.load %arg6[%c0_3, %c0_4] : memref<1x32xf32, #tpu.memory_space<vmem>>, vector<1x32xf32>
    %4 = vector.broadcast %3 : vector<1x32xf32> to vector<8x32xf32>
    %5 = arith.addf %2, %4 : vector<8x32xf32>
    %cst_5 = arith.constant 0.000000e+00 : f32
    %6 = vector.broadcast %cst_5 : f32 to vector<8x32xf32>
    %7 = arith.maximumf %5, %6 : vector<8x32xf32>
    %8 = arith.truncf %7 : vector<8x32xf32> to vector<8x32xbf16>
    %c0_6 = arith.constant 0 : index
    %c0_7 = arith.constant 0 : index
    %9 = vector.load %arg2[%c0_6, %c0_7] : memref<8x2xf32, #tpu.memory_space<vmem>>, vector<8x2xf32>
    %10 = arith.truncf %9 : vector<8x2xf32> to vector<8x2xbf16>
    %c0_8 = arith.constant 0 : index
    %c0_9 = arith.constant 0 : index
    %11 = vector.load %arg3[%c0_8, %c0_9] : memref<8x32xf32, #tpu.memory_space<vmem>>, vector<8x32xf32>
    %c0_10 = arith.constant 0 : index
    %c0_11 = arith.constant 0 : index
    %12 = vector.load %arg4[%c0_10, %c0_11] : memref<8x1xf32, #tpu.memory_space<vmem>>, vector<8x1xf32>
    %13 = vector.broadcast %12 : vector<8x1xf32> to vector<8x32xf32>
    %14 = arith.mulf %11, %13 : vector<8x32xf32>
    %15 = arith.truncf %14 : vector<8x32xf32> to vector<8x32xbf16>
    %c0_12 = arith.constant 0 : index
    %c0_13 = arith.constant 0 : index
    %c0_14 = arith.constant 0 : index
    %16 = vector.load %arg7[%c0_12, %c0_13, %c0_14] : memref<3x32x32xbf16, #tpu.memory_space<vmem>>, vector<1x32x32xbf16>
    %17 = vector.shape_cast %16 : vector<1x32x32xbf16> to vector<32x32xbf16>
    %cst_15 = arith.constant dense<0.000000e+00> : vector<8x32xf32>
    %18 = tpu.matmul %8, %17, %cst_15 {dimension_numbers = #tpu.dot_dimension_numbers<[1], [0], [0], [1], [0, 0, 1, 1], [], []>} : vector<8x32xbf16>, vector<32x32xbf16>, vector<8x32xf32> -> vector<8x32xf32>
    %c0_16 = arith.constant 0 : index
    %c0_17 = arith.constant 0 : index
    %c0_18 = arith.constant 0 : index
    %19 = vector.load %arg8[%c0_16, %c0_17, %c0_18] : memref<3x2x32xbf16, #tpu.memory_space<vmem>>, vector<1x2x32xbf16>
    %20 = vector.shape_cast %19 : vector<1x2x32xbf16> to vector<2x32xbf16>
    %cst_19 = arith.constant dense<0.000000e+00> : vector<8x32xf32>
    %21 = tpu.matmul %10, %20, %cst_19 {dimension_numbers = #tpu.dot_dimension_numbers<[1], [0], [0], [1], [0, 0, 1, 1], [], []>} : vector<8x2xbf16>, vector<2x32xbf16>, vector<8x32xf32> -> vector<8x32xf32>
    %22 = arith.addf %18, %21 : vector<8x32xf32>
    %c0_20 = arith.constant 0 : index
    %c0_21 = arith.constant 0 : index
    %c0_22 = arith.constant 0 : index
    %23 = vector.load %arg10[%c0_20, %c0_21, %c0_22] : memref<3x1x32xf32, #tpu.memory_space<vmem>>, vector<1x1x32xf32>
    %24 = vector.shape_cast %23 : vector<1x1x32xf32> to vector<1x32xf32>
    %25 = vector.broadcast %24 : vector<1x32xf32> to vector<8x32xf32>
    %26 = arith.addf %22, %25 : vector<8x32xf32>
    %c0_23 = arith.constant 0 : index
    %c0_24 = arith.constant 0 : index
    %c0_25 = arith.constant 0 : index
    %27 = vector.load %arg9[%c0_23, %c0_24, %c0_25] : memref<3x32x32xbf16, #tpu.memory_space<vmem>>, vector<1x32x32xbf16>
    %28 = vector.shape_cast %27 : vector<1x32x32xbf16> to vector<32x32xbf16>
    %cst_26 = arith.constant dense<0.000000e+00> : vector<8x32xf32>
    %29 = tpu.matmul %15, %28, %cst_26 {dimension_numbers = #tpu.dot_dimension_numbers<[1], [0], [0], [1], [0, 0, 1, 1], [], []>} : vector<8x32xbf16>, vector<32x32xbf16>, vector<8x32xf32> -> vector<8x32xf32>
    %c0_27 = arith.constant 0 : index
    %c0_28 = arith.constant 0 : index
    %c0_29 = arith.constant 0 : index
    %30 = vector.load %arg11[%c0_27, %c0_28, %c0_29] : memref<3x1x32xf32, #tpu.memory_space<vmem>>, vector<1x1x32xf32>
    %31 = vector.shape_cast %30 : vector<1x1x32xf32> to vector<1x32xf32>
    %32 = vector.broadcast %31 : vector<1x32xf32> to vector<8x32xf32>
    %33 = arith.addf %29, %32 : vector<8x32xf32>
    %34 = arith.addf %26, %33 : vector<8x32xf32>
    %35 = arith.negf %34 : vector<8x32xf32>
    %36 = math.exp %35 : vector<8x32xf32>
    %cst_30 = arith.constant 1.000000e+00 : f32
    %37 = vector.broadcast %cst_30 : f32 to vector<8x32xf32>
    %38 = arith.addf %37, %36 : vector<8x32xf32>
    %39 = arith.divf %37, %38 : vector<8x32xf32>
    %c1 = arith.constant 1 : index
    %c0_31 = arith.constant 0 : index
    %c0_32 = arith.constant 0 : index
    %40 = vector.load %arg7[%c1, %c0_31, %c0_32] : memref<3x32x32xbf16, #tpu.memory_space<vmem>>, vector<1x32x32xbf16>
    %41 = vector.shape_cast %40 : vector<1x32x32xbf16> to vector<32x32xbf16>
    %cst_33 = arith.constant dense<0.000000e+00> : vector<8x32xf32>
    %42 = tpu.matmul %8, %41, %cst_33 {dimension_numbers = #tpu.dot_dimension_numbers<[1], [0], [0], [1], [0, 0, 1, 1], [], []>} : vector<8x32xbf16>, vector<32x32xbf16>, vector<8x32xf32> -> vector<8x32xf32>
    %c1_34 = arith.constant 1 : index
    %c0_35 = arith.constant 0 : index
    %c0_36 = arith.constant 0 : index
    %43 = vector.load %arg8[%c1_34, %c0_35, %c0_36] : memref<3x2x32xbf16, #tpu.memory_space<vmem>>, vector<1x2x32xbf16>
    %44 = vector.shape_cast %43 : vector<1x2x32xbf16> to vector<2x32xbf16>
    %cst_37 = arith.constant dense<0.000000e+00> : vector<8x32xf32>
    %45 = tpu.matmul %10, %44, %cst_37 {dimension_numbers = #tpu.dot_dimension_numbers<[1], [0], [0], [1], [0, 0, 1, 1], [], []>} : vector<8x2xbf16>, vector<2x32xbf16>, vector<8x32xf32> -> vector<8x32xf32>
    %46 = arith.addf %42, %45 : vector<8x32xf32>
    %c1_38 = arith.constant 1 : index
    %c0_39 = arith.constant 0 : index
    %c0_40 = arith.constant 0 : index
    %47 = vector.load %arg10[%c1_38, %c0_39, %c0_40] : memref<3x1x32xf32, #tpu.memory_space<vmem>>, vector<1x1x32xf32>
    %48 = vector.shape_cast %47 : vector<1x1x32xf32> to vector<1x32xf32>
    %49 = vector.broadcast %48 : vector<1x32xf32> to vector<8x32xf32>
    %50 = arith.addf %46, %49 : vector<8x32xf32>
    %c1_41 = arith.constant 1 : index
    %c0_42 = arith.constant 0 : index
    %c0_43 = arith.constant 0 : index
    %51 = vector.load %arg9[%c1_41, %c0_42, %c0_43] : memref<3x32x32xbf16, #tpu.memory_space<vmem>>, vector<1x32x32xbf16>
    %52 = vector.shape_cast %51 : vector<1x32x32xbf16> to vector<32x32xbf16>
    %cst_44 = arith.constant dense<0.000000e+00> : vector<8x32xf32>
    %53 = tpu.matmul %15, %52, %cst_44 {dimension_numbers = #tpu.dot_dimension_numbers<[1], [0], [0], [1], [0, 0, 1, 1], [], []>} : vector<8x32xbf16>, vector<32x32xbf16>, vector<8x32xf32> -> vector<8x32xf32>
    %c1_45 = arith.constant 1 : index
    %c0_46 = arith.constant 0 : index
    %c0_47 = arith.constant 0 : index
    %54 = vector.load %arg11[%c1_45, %c0_46, %c0_47] : memref<3x1x32xf32, #tpu.memory_space<vmem>>, vector<1x1x32xf32>
    %55 = vector.shape_cast %54 : vector<1x1x32xf32> to vector<1x32xf32>
    %56 = vector.broadcast %55 : vector<1x32xf32> to vector<8x32xf32>
    %57 = arith.addf %53, %56 : vector<8x32xf32>
    %58 = arith.addf %50, %57 : vector<8x32xf32>
    %59 = arith.negf %58 : vector<8x32xf32>
    %60 = math.exp %59 : vector<8x32xf32>
    %cst_48 = arith.constant 1.000000e+00 : f32
    %61 = vector.broadcast %cst_48 : f32 to vector<8x32xf32>
    %62 = arith.addf %61, %60 : vector<8x32xf32>
    %63 = arith.divf %61, %62 : vector<8x32xf32>
    %c2 = arith.constant 2 : index
    %c0_49 = arith.constant 0 : index
    %c0_50 = arith.constant 0 : index
    %64 = vector.load %arg7[%c2, %c0_49, %c0_50] : memref<3x32x32xbf16, #tpu.memory_space<vmem>>, vector<1x32x32xbf16>
    %65 = vector.shape_cast %64 : vector<1x32x32xbf16> to vector<32x32xbf16>
    %cst_51 = arith.constant dense<0.000000e+00> : vector<8x32xf32>
    %66 = tpu.matmul %8, %65, %cst_51 {dimension_numbers = #tpu.dot_dimension_numbers<[1], [0], [0], [1], [0, 0, 1, 1], [], []>} : vector<8x32xbf16>, vector<32x32xbf16>, vector<8x32xf32> -> vector<8x32xf32>
    %c2_52 = arith.constant 2 : index
    %c0_53 = arith.constant 0 : index
    %c0_54 = arith.constant 0 : index
    %67 = vector.load %arg8[%c2_52, %c0_53, %c0_54] : memref<3x2x32xbf16, #tpu.memory_space<vmem>>, vector<1x2x32xbf16>
    %68 = vector.shape_cast %67 : vector<1x2x32xbf16> to vector<2x32xbf16>
    %cst_55 = arith.constant dense<0.000000e+00> : vector<8x32xf32>
    %69 = tpu.matmul %10, %68, %cst_55 {dimension_numbers = #tpu.dot_dimension_numbers<[1], [0], [0], [1], [0, 0, 1, 1], [], []>} : vector<8x2xbf16>, vector<2x32xbf16>, vector<8x32xf32> -> vector<8x32xf32>
    %70 = arith.addf %66, %69 : vector<8x32xf32>
    %c2_56 = arith.constant 2 : index
    %c0_57 = arith.constant 0 : index
    %c0_58 = arith.constant 0 : index
    %71 = vector.load %arg10[%c2_56, %c0_57, %c0_58] : memref<3x1x32xf32, #tpu.memory_space<vmem>>, vector<1x1x32xf32>
    %72 = vector.shape_cast %71 : vector<1x1x32xf32> to vector<1x32xf32>
    %73 = vector.broadcast %72 : vector<1x32xf32> to vector<8x32xf32>
    %74 = arith.addf %70, %73 : vector<8x32xf32>
    %c2_59 = arith.constant 2 : index
    %c0_60 = arith.constant 0 : index
    %c0_61 = arith.constant 0 : index
    %75 = vector.load %arg9[%c2_59, %c0_60, %c0_61] : memref<3x32x32xbf16, #tpu.memory_space<vmem>>, vector<1x32x32xbf16>
    %76 = vector.shape_cast %75 : vector<1x32x32xbf16> to vector<32x32xbf16>
    %cst_62 = arith.constant dense<0.000000e+00> : vector<8x32xf32>
    %77 = tpu.matmul %15, %76, %cst_62 {dimension_numbers = #tpu.dot_dimension_numbers<[1], [0], [0], [1], [0, 0, 1, 1], [], []>} : vector<8x32xbf16>, vector<32x32xbf16>, vector<8x32xf32> -> vector<8x32xf32>
    %c2_63 = arith.constant 2 : index
    %c0_64 = arith.constant 0 : index
    %c0_65 = arith.constant 0 : index
    %78 = vector.load %arg11[%c2_63, %c0_64, %c0_65] : memref<3x1x32xf32, #tpu.memory_space<vmem>>, vector<1x1x32xf32>
    %79 = vector.shape_cast %78 : vector<1x1x32xf32> to vector<1x32xf32>
    %80 = vector.broadcast %79 : vector<1x32xf32> to vector<8x32xf32>
    %81 = arith.addf %77, %80 : vector<8x32xf32>
    %82 = arith.mulf %39, %81 : vector<8x32xf32>
    %83 = arith.addf %74, %82 : vector<8x32xf32>
    %84 = math.tanh %83 : vector<8x32xf32>
    %cst_66 = arith.constant 1.000000e+00 : f32
    %85 = vector.broadcast %cst_66 : f32 to vector<8x32xf32>
    %86 = arith.subf %85, %63 : vector<8x32xf32>
    %87 = arith.mulf %86, %84 : vector<8x32xf32>
    %88 = arith.mulf %63, %14 : vector<8x32xf32>
    %89 = arith.addf %87, %88 : vector<8x32xf32>
    %c0_67 = arith.constant 0 : index
    %c0_68 = arith.constant 0 : index
    %90 = vector.load %arg15[%c0_67, %c0_68] : memref<8x32xf32, #tpu.memory_space<vmem>>, vector<8x32xf32>
    tpu.vector_store %arg15[%c0_67, %c0_68], %89 {strides = array<i32>} : memref<8x32xf32, #tpu.memory_space<vmem>>, vector<8x32xf32>,
    %c0_69 = arith.constant 0 : index
    %c0_70 = arith.constant 0 : index
    %91 = vector.load %arg12[%c0_69, %c0_70] : memref<1x32xf32, #tpu.memory_space<vmem>>, vector<1x32xf32>
    %92 = vector.broadcast %91 : vector<1x32xf32> to vector<8x32xf32>
    %93 = arith.mulf %89, %92 : vector<8x32xf32>
    %cst_71 = arith.constant dense<0.000000e+00> : vector<8xf32>
    %94 = vector.multi_reduction <add>, %93, %cst_71 [1] : vector<8x32xf32> to vector<8xf32>
    %95 = vector.shape_cast %94 : vector<8xf32> to vector<8x1xf32>
    %c0_72 = arith.constant 0 : index
    %c0_73 = arith.constant 0 : index
    %96 = vector.load %arg13[%c0_72, %c0_73] : memref<1x1xf32, #tpu.memory_space<vmem>>, vector<1x1xf32>
    %97 = vector.broadcast %96 : vector<1x1xf32> to vector<8x1xf32>
    %98 = arith.addf %95, %97 : vector<8x1xf32>
    %c0_74 = arith.constant 0 : index
    %c0_75 = arith.constant 0 : index
    %99 = vector.load %arg14[%c0_74, %c0_75] : memref<8x1xf32, #tpu.memory_space<vmem>>, vector<8x1xf32>
    tpu.vector_store %arg14[%c0_74, %c0_75], %98 {strides = array<i32>} : memref<8x1xf32, #tpu.memory_space<vmem>>, vector<8x1xf32>,
    return
  }
  func.func @transform_0(%arg0: i32) -> (i32, i32) {
    %c0_i32 = arith.constant 0 : i32
    %c0_i32_0 = arith.constant 0 : i32
    return %arg0, %c0_i32 : i32, i32
  }
  func.func @transform_1(%arg0: i32) -> (i32, i32) {
    %c0_i32 = arith.constant 0 : i32
    %c0_i32_0 = arith.constant 0 : i32
    return %arg0, %c0_i32 : i32, i32
  }
  func.func @transform_2(%arg0: i32) -> (i32, i32) {
    %c0_i32 = arith.constant 0 : i32
    %c0_i32_0 = arith.constant 0 : i32
    return %arg0, %c0_i32 : i32, i32
  }
  func.func @transform_3(%arg0: i32) -> (i32, i32) {
    %c0_i32 = arith.constant 0 : i32
    %c0_i32_0 = arith.constant 0 : i32
    return %arg0, %c0_i32 : i32, i32
  }
  func.func @transform_4(%arg0: i32) -> (i32, i32) {
    %c0_i32 = arith.constant 0 : i32
    %c0_i32_0 = arith.constant 0 : i32
    %c0_i32_1 = arith.constant 0 : i32
    return %c0_i32, %c0_i32_0 : i32, i32
  }
  func.func @transform_5(%arg0: i32) -> (i32, i32) {
    %c0_i32 = arith.constant 0 : i32
    %c0_i32_0 = arith.constant 0 : i32
    %c0_i32_1 = arith.constant 0 : i32
    return %c0_i32, %c0_i32_0 : i32, i32
  }
  func.func @transform_6(%arg0: i32) -> (i32, i32, i32) {
    %c0_i32 = arith.constant 0 : i32
    %c0_i32_0 = arith.constant 0 : i32
    %c0_i32_1 = arith.constant 0 : i32
    %c0_i32_2 = arith.constant 0 : i32
    return %c0_i32, %c0_i32_0, %c0_i32_1 : i32, i32, i32
  }
  func.func @transform_7(%arg0: i32) -> (i32, i32, i32) {
    %c0_i32 = arith.constant 0 : i32
    %c0_i32_0 = arith.constant 0 : i32
    %c0_i32_1 = arith.constant 0 : i32
    %c0_i32_2 = arith.constant 0 : i32
    return %c0_i32, %c0_i32_0, %c0_i32_1 : i32, i32, i32
  }
  func.func @transform_8(%arg0: i32) -> (i32, i32, i32) {
    %c0_i32 = arith.constant 0 : i32
    %c0_i32_0 = arith.constant 0 : i32
    %c0_i32_1 = arith.constant 0 : i32
    %c0_i32_2 = arith.constant 0 : i32
    return %c0_i32, %c0_i32_0, %c0_i32_1 : i32, i32, i32
  }
  func.func @transform_9(%arg0: i32) -> (i32, i32, i32) {
    %c0_i32 = arith.constant 0 : i32
    %c0_i32_0 = arith.constant 0 : i32
    %c0_i32_1 = arith.constant 0 : i32
    %c0_i32_2 = arith.constant 0 : i32
    return %c0_i32, %c0_i32_0, %c0_i32_1 : i32, i32, i32
  }
  func.func @transform_10(%arg0: i32) -> (i32, i32, i32) {
    %c0_i32 = arith.constant 0 : i32
    %c0_i32_0 = arith.constant 0 : i32
    %c0_i32_1 = arith.constant 0 : i32
    %c0_i32_2 = arith.constant 0 : i32
    return %c0_i32, %c0_i32_0, %c0_i32_1 : i32, i32, i32
  }
  func.func @transform_11(%arg0: i32) -> (i32, i32) {
    %c0_i32 = arith.constant 0 : i32
    %c0_i32_0 = arith.constant 0 : i32
    %c0_i32_1 = arith.constant 0 : i32
    return %c0_i32, %c0_i32_0 : i32, i32
  }
  func.func @transform_12(%arg0: i32) -> (i32, i32) {
    %c0_i32 = arith.constant 0 : i32
    %c0_i32_0 = arith.constant 0 : i32
    %c0_i32_1 = arith.constant 0 : i32
    return %c0_i32, %c0_i32_0 : i32, i32
  }
  func.func @transform_13(%arg0: i32) -> (i32, i32) {
    %c0_i32 = arith.constant 0 : i32
    %c0_i32_0 = arith.constant 0 : i32
    return %arg0, %c0_i32 : i32, i32
  }
  func.func @transform_14(%arg0: i32) -> (i32, i32) {
    %c0_i32 = arith.constant 0 : i32
    %c0_i32_0 = arith.constant 0 : i32
    return %arg0, %c0_i32 : i32, i32
  }
}

</mosaic_0001>

<bundles_post_ra>
// kernel: net_forward.4
= control target key start
LH: loop header
LB: loop body
LE: loop exit
PB: predicated region body
PF: predicated region fallthrough
CT: control target
= control target key end

     0   :  { %s1021_s12 = smov 0   ;;  %s1194_s0 = inlined_call_operand.vmem [shape: bf16[512,64], index: 0, kind: input, shape index: {}]   ;;  %s1195_s1 = inlined_call_operand.vmem [shape: bf16[64,32], index: 1, kind: input, shape index: {}]   ;;  %s1196_s2 = inlined_call_operand.vmem [shape: f32[1,32], index: 2, kind: input, shape index: {}]   ;;  %s1197_s3 = inlined_call_operand.vmem [shape: bf16[512,32], index: 3, kind: output, shape index: {}]  }
   0x1 LB: > { %s785_s13 = sadd.s32 4294967295, %s999_s12   ;;  %p789_p0 = scmp.ge.s32.totalorder %s999_s12, 1  ;;  %s999_s12 = sphi %s1021_s12, %s13_s12  }
   0x2   : > { %p138_p1 = scmp.lt.s32.totalorder %s999_s12, 3 }
   0x4   : > { %p139_p2 = pnand %p789_p0, %p138_p1 }
   0x5   : > { %v973_v0 = vld [vmem:[%s1195_s1] sm:$0xff] (!%p139_p2)   ;;  %s790_s16 = sshll.u32 (!%p139_p2), %s785_s13, 5  ;;  %v974_v1 = vld [vmem:[%s1195_s1 + $0x8] sm:$0xff] (!%p139_p2)   ;;  %v975_v2 = vld [vmem:[%s1195_s1 + $0x10] sm:$0xff] (!%p139_p2)   ;;  %vm326_vm0 = vcmask (!%p139_p2), 523264   ;;  %vm696_vm1 = vcmask (!%p139_p2), 257024  }
   0x6   : > { %142 = sbr.rel (%p139_p2) target bundleno = 268 (0x10c), region = 32  ;;  %p163_p3 = scmp.lt.s32.totalorder (!%p139_p2), %s790_s16, 63  ;;  %917 = vmatprep.subr.bf16.mxu0 (!%p139_p2), %v973_v0  ;;  %957 = vmatprep.subr.bf16.mxu1 (!%p139_p2), %v973_v0  ;;  %v976_v3 = vld [vmem:[%s1195_s1 + $0x18] sm:$0xff] (!%p139_p2)   ;;  %v1086_v20 = vld [vmem:[%s1196_s2] ss:$0 sm:$0xff] (!%p139_p2) }
   0x7   : > { %918 = vmatpush3.bf16.msra.mxu0 (!%p139_p2), %v973_v0  ;;  %961 = vmatpush3.bf16.msra.mxu1 (!%p139_p2), %v973_v0 }
   0x8   : > { %919 = vmatprep.subr.bf16.mxu0 (!%p139_p2), %v974_v1  ;;  %958 = vmatprep.subr.bf16.mxu1 (!%p139_p2), %v974_v1 }
   0xb   : > { %920 = vmatpush3.bf16.msra.mxu0 (!%p139_p2), %v974_v1  ;;  %962 = vmatpush3.bf16.msra.mxu1 (!%p139_p2), %v974_v1 }
   0xc   : > { %921 = vmatprep.subr.bf16.mxu0 (!%p139_p2), %v975_v2  ;;  %959 = vmatprep.subr.bf16.mxu1 (!%p139_p2), %v975_v2 }
   0xd   : > { %s1199_s16 = smov (!%p163_p3, %s790_s16), 63 }
   0xe   : > { %s791_s21 = sshll.u32 %s1199_s16, 2 }
   0xf   : > { %s1049_s26 = scalar_lea.vmem %s1194_s0, %s791_s21  ;;  %922 = vmatpush3.bf16.msra.mxu0 %v975_v2  ;;  %963 = vmatpush3.bf16.msra.mxu1 %v975_v2  ;;  %s1099_s4 = scalar_lea.vmem %s1197_s3, %s791_s21 }
  0x10   : > { %v977_v4 = vld [vmem:[%s1049_s26] sm:$0xff]   ;;  %923 = vmatprep.subr.bf16.mxu0 %v976_v3  ;;  %960 = vmatprep.subr.bf16.mxu1 %v976_v3  ;;  %v979_v6 = vld [vmem:[%s1049_s26 + $0x8] sm:$0xff]   ;;  %v981_v8 = vld [vmem:[%s1049_s26 + $0x10] sm:$0xff]  }
  0x11   : > { %v978_v5 = vld [vmem:[%s1049_s26 + $0x40] sm:$0xff]   ;;  %925 = vmatprep.mubr.msk.bf16.mxu0 %vm326_vm0, %v977_v4  ;;  %v980_v7 = vld [vmem:[%s1049_s26 + $0x48] sm:$0xff]   ;;  %v982_v9 = vld [vmem:[%s1049_s26 + $0x50] sm:$0xff]  }
  0x12   : > { %941 = vmatprep.mubr.msk.bf16.mxu1 %vm326_vm0, %v978_v5  ;;  %v983_v10 = vld [vmem:[%s1049_s26 + $0x18] sm:$0xff]   ;;  %v985_v12 = vld [vmem:[%s1049_s26 + $0x20] sm:$0xff]   ;;  %v987_v14 = vld [vmem:[%s1049_s26 + $0x28] sm:$0xff]  }
  0x13   : > { %924 = vmatpush3.bf16.msra.mxu0 %v976_v3  ;;  %964 = vmatpush3.bf16.msra.mxu1 %v976_v3  ;;  %v984_v11 = vld [vmem:[%s1049_s26 + $0x58] sm:$0xff]   ;;  %v986_v13 = vld [vmem:[%s1049_s26 + $0x60] sm:$0xff]   ;;  %v988_v15 = vld [vmem:[%s1049_s26 + $0x68] sm:$0xff]  }
  0x14   : > { %v989_v16 = vld [vmem:[%s1049_s26 + $0x30] sm:$0xff]   ;;  %v991_v18 = vld [vmem:[%s1049_s26 + $0x38] sm:$0xff]  }
  0x15   : > { %v990_v17 = vld [vmem:[%s1049_s26 + $0x70] sm:$0xff]   ;;  %v992_v19 = vld [vmem:[%s1049_s26 + $0x78] sm:$0xff]  }
  0x16   : > { %926 = vmatmul.mubr.msk.bf16.vlgmr.msra.gmra.mrb[0].mxu0 %vm326_vm0, %v979_v6  ;;  %942 = vmatmul.mubr.msk.bf16.vlgmr.msra.gmra.mrb[0].mxu1 %vm326_vm0, %v980_v7 }
  0x17   : > { %929 = vmatprep.mubr.msk.bf16.mxu0 %vm326_vm0, %v981_v8  ;;  %945 = vmatprep.mubr.msk.bf16.mxu1 %vm326_vm0, %v982_v9 }
  0x1e   : > { %930 = vmatmul.mubr.msk.bf16.gmra.mrb[4].mxu0 %vm326_vm0, %v983_v10  ;;  %946 = vmatmul.mubr.msk.bf16.gmra.mrb[4].mxu1 %vm326_vm0, %v984_v11 }
  0x1f   : > { %933 = vmatprep.mubr.msk.bf16.mxu0 %vm326_vm0, %v985_v12  ;;  %949 = vmatprep.mubr.msk.bf16.mxu1 %vm326_vm0, %v986_v13 }
  0x26   : > { %934 = vmatmul.mubr.msk.bf16.gmra.mrb[8].mxu0 %vm326_vm0, %v987_v14  ;;  %950 = vmatmul.mubr.msk.bf16.gmra.mrb[8].mxu1 %vm326_vm0, %v988_v15 }
  0x27   : > { %937 = vmatprep.mubr.msk.bf16.mxu0 %vm326_vm0, %v989_v16  ;;  %953 = vmatprep.mubr.msk.bf16.mxu1 %vm326_vm0, %v990_v17 }
  0x2e   : > { %938 = vmatmul.mubr.msk.bf16.gmra.mrb[12].mxu0 %vm326_vm0, %v991_v18  ;;  %954 = vmatmul.mubr.msk.bf16.gmra.mrb[12].mxu1 %vm326_vm0, %v992_v19 }
  0xe9   : > { %v927_v21 = vpop.f32.mrb[0].mxu0  ;;  %v943_v22 = vpop.f32.mrb[0].mxu1 }
  0xea   : > { %v418_v23 = vadd.f32 %v927_v21, %v1086_v20  ;;  %v482_v24 = vadd.f32 %v943_v22, %v1086_v20  ;;  %v409_v25 = vpop.f32.mrb[1].mxu0  ;;  %v473_v26 = vpop.f32.mrb[1].mxu1 }
  0xeb   : > { %v410_v27 = vadd.f32 %v1086_v20, %v409_v25  ;;  %v474_v28 = vadd.f32 %v1086_v20, %v473_v26  ;;  %v928_v29 = vpop.f32.mrb[2].mxu0  ;;  %v944_v30 = vpop.f32.mrb[2].mxu1 }
  0xec   : > { %v538_v31 = vmax.f32 %v418_v23, 0.0  ;;  %v554_v32 = vmax.f32 %v482_v24, 0.0  ;;  %v421_v33 = vadd.f32 %v928_v29, %v1086_v20  ;;  %v485_v34 = vadd.f32 %v944_v30, %v1086_v20  ;;  %v412_v35 = vpop.f32.mrb[3].mxu0  ;;  %v476_v36 = vpop.f32.mrb[3].mxu1 }
  0xed   : > { %v536_v37 = vmax.f32 %v410_v27, 0.0  ;;  %v552_v38 = vmax.f32 %v474_v28, 0.0  ;;  %v413_v39 = vadd.f32 %v1086_v20, %v412_v35  ;;  %v477_v40 = vadd.f32 %v1086_v20, %v476_v36 }
  0xee   : > { %v867_v41 = vpack.c.bf16 %v538_v31, %v538_v31  ;;  %v883_v42 = vpack.c.bf16 %v554_v32, %v554_v32  ;;  %v539_v43 = vmax.f32 %v421_v33, 0.0  ;;  %v555_v44 = vmax.f32 %v485_v34, 0.0 }
  0xef   : > { %v865_v45 = vpack.c.bf16 %v536_v37, %v536_v37  ;;  %v881_v46 = vpack.c.bf16 %v552_v38, %v552_v38  ;;  %v537_v47 = vmax.f32 %v413_v39, 0.0  ;;  %v553_v48 = vmax.f32 %v477_v40, 0.0 }
  0xf0   : > { %699 = vst.msk [vmem:[%s1099_s4 + $0x8] sm:$0xf] %vm696_vm1, %v867_v41  ;;  %715 = vst.msk [vmem:[%s1099_s4 + $0x48] sm:$0xf] %vm696_vm1, %v883_v42  ;;  %v868_v49 = vpack.c.bf16 %v539_v43, %v539_v43  ;;  %v884_v50 = vpack.c.bf16 %v555_v44, %v555_v44 }
  0xf1   : > { %697 = vst.msk [vmem:[%s1099_s4] sm:$0xf] %vm696_vm1, %v865_v45  ;;  %713 = vst.msk [vmem:[%s1099_s4 + $0x40] sm:$0xf] %vm696_vm1, %v881_v46  ;;  %v866_v51 = vpack.c.bf16 %v537_v47, %v537_v47  ;;  %v882_v52 = vpack.c.bf16 %v553_v48, %v553_v48  ;;  %v931_v53 = vpop.f32.mrb[4].mxu0  ;;  %v947_v54 = vpop.f32.mrb[4].mxu1 }
  0xf2   : > { %700 = vst.msk [vmem:[%s1099_s4 + $0xc] sm:$0xf] %vm696_vm1, %v868_v49  ;;  %716 = vst.msk [vmem:[%s1099_s4 + $0x4c] sm:$0xf] %vm696_vm1, %v884_v50  ;;  %v434_v55 = vadd.f32 %v931_v53, %v1086_v20  ;;  %v498_v56 = vadd.f32 %v947_v54, %v1086_v20  ;;  %v425_v57 = vpop.f32.mrb[5].mxu0  ;;  %v489_v58 = vpop.f32.mrb[5].mxu1 }
  0xf3   : > { %698 = vst.msk [vmem:[%s1099_s4 + $0x4] sm:$0xf] %vm696_vm1, %v866_v51  ;;  %714 = vst.msk [vmem:[%s1099_s4 + $0x44] sm:$0xf] %vm696_vm1, %v882_v52  ;;  %v426_v59 = vadd.f32 %v1086_v20, %v425_v57  ;;  %v490_v60 = vadd.f32 %v1086_v20, %v489_v58  ;;  %v932_v61 = vpop.f32.mrb[6].mxu0  ;;  %v948_v62 = vpop.f32.mrb[6].mxu1 }
  0xf4   : > { %v542_v63 = vmax.f32 %v434_v55, 0.0  ;;  %v558_v0 = vmax.f32 %v498_v56, 0.0  ;;  %v437_v1 = vadd.f32 %v932_v61, %v1086_v20  ;;  %v501_v2 = vadd.f32 %v948_v62, %v1086_v20  ;;  %v428_v3 = vpop.f32.mrb[7].mxu0  ;;  %v492_v4 = vpop.f32.mrb[7].mxu1 }
  0xf5   : > { %v540_v5 = vmax.f32 %v426_v59, 0.0  ;;  %v556_v6 = vmax.f32 %v490_v60, 0.0  ;;  %v429_v7 = vadd.f32 %v1086_v20, %v428_v3  ;;  %v493_v8 = vadd.f32 %v1086_v20, %v492_v4 }
  0xf6   : > { %v871_v9 = vpack.c.bf16 %v542_v63, %v542_v63  ;;  %v887_v10 = vpack.c.bf16 %v558_v0, %v558_v0  ;;  %v543_v11 = vmax.f32 %v437_v1, 0.0  ;;  %v559_v12 = vmax.f32 %v501_v2, 0.0 }
  0xf7   : > { %v869_v13 = vpack.c.bf16 %v540_v5, %v540_v5  ;;  %v885_v14 = vpack.c.bf16 %v556_v6, %v556_v6  ;;  %v541_v15 = vmax.f32 %v429_v7, 0.0  ;;  %v557_v16 = vmax.f32 %v493_v8, 0.0 }
  0xf8   : > { %703 = vst.msk [vmem:[%s1099_s4 + $0x18] sm:$0xf] %vm696_vm1, %v871_v9  ;;  %719 = vst.msk [vmem:[%s1099_s4 + $0x58] sm:$0xf] %vm696_vm1, %v887_v10  ;;  %v872_v17 = vpack.c.bf16 %v543_v11, %v543_v11  ;;  %v888_v18 = vpack.c.bf16 %v559_v12, %v559_v12 }
  0xf9   : > { %701 = vst.msk [vmem:[%s1099_s4 + $0x10] sm:$0xf] %vm696_vm1, %v869_v13  ;;  %717 = vst.msk [vmem:[%s1099_s4 + $0x50] sm:$0xf] %vm696_vm1, %v885_v14  ;;  %v870_v19 = vpack.c.bf16 %v541_v15, %v541_v15  ;;  %v886_v21 = vpack.c.bf16 %v557_v16, %v557_v16  ;;  %v935_v22 = vpop.f32.mrb[8].mxu0  ;;  %v951_v23 = vpop.f32.mrb[8].mxu1 }
  0xfa   : > { %704 = vst.msk [vmem:[%s1099_s4 + $0x1c] sm:$0xf] %vm696_vm1, %v872_v17  ;;  %720 = vst.msk [vmem:[%s1099_s4 + $0x5c] sm:$0xf] %vm696_vm1, %v888_v18  ;;  %v450_v24 = vadd.f32 %v935_v22, %v1086_v20  ;;  %v514_v25 = vadd.f32 %v951_v23, %v1086_v20  ;;  %v441_v26 = vpop.f32.mrb[9].mxu0  ;;  %v505_v27 = vpop.f32.mrb[9].mxu1 }
  0xfb   : > { %702 = vst.msk [vmem:[%s1099_s4 + $0x14] sm:$0xf] %vm696_vm1, %v870_v19  ;;  %718 = vst.msk [vmem:[%s1099_s4 + $0x54] sm:$0xf] %vm696_vm1, %v886_v21  ;;  %v442_v28 = vadd.f32 %v1086_v20, %v441_v26  ;;  %v506_v29 = vadd.f32 %v1086_v20, %v505_v27  ;;  %v936_v30 = vpop.f32.mrb[10].mxu0  ;;  %v952_v31 = vpop.f32.mrb[10].mxu1 }
  0xfc   : > { %v546_v32 = vmax.f32 %v450_v24, 0.0  ;;  %v562_v33 = vmax.f32 %v514_v25, 0.0  ;;  %v453_v34 = vadd.f32 %v936_v30, %v1086_v20  ;;  %v517_v35 = vadd.f32 %v952_v31, %v1086_v20  ;;  %v444_v36 = vpop.f32.mrb[11].mxu0  ;;  %v508_v37 = vpop.f32.mrb[11].mxu1 }
  0xfd   : > { %v544_v38 = vmax.f32 %v442_v28, 0.0  ;;  %v560_v39 = vmax.f32 %v506_v29, 0.0  ;;  %v445_v40 = vadd.f32 %v1086_v20, %v444_v36  ;;  %v509_v41 = vadd.f32 %v1086_v20, %v508_v37 }
  0xfe   : > { %v875_v42 = vpack.c.bf16 %v546_v32, %v546_v32  ;;  %v891_v43 = vpack.c.bf16 %v562_v33, %v562_v33  ;;  %v547_v44 = vmax.f32 %v453_v34, 0.0  ;;  %v563_v45 = vmax.f32 %v517_v35, 0.0 }
  0xff   : > { %v873_v46 = vpack.c.bf16 %v544_v38, %v544_v38  ;;  %v889_v47 = vpack.c.bf16 %v560_v39, %v560_v39  ;;  %v545_v48 = vmax.f32 %v445_v40, 0.0  ;;  %v561_v49 = vmax.f32 %v509_v41, 0.0 }
 0x100   : > { %707 = vst.msk [vmem:[%s1099_s4 + $0x28] sm:$0xf] %vm696_vm1, %v875_v42  ;;  %723 = vst.msk [vmem:[%s1099_s4 + $0x68] sm:$0xf] %vm696_vm1, %v891_v43  ;;  %v876_v50 = vpack.c.bf16 %v547_v44, %v547_v44  ;;  %v892_v51 = vpack.c.bf16 %v563_v45, %v563_v45 }
 0x101   : > { %705 = vst.msk [vmem:[%s1099_s4 + $0x20] sm:$0xf] %vm696_vm1, %v873_v46  ;;  %721 = vst.msk [vmem:[%s1099_s4 + $0x60] sm:$0xf] %vm696_vm1, %v889_v47  ;;  %v874_v52 = vpack.c.bf16 %v545_v48, %v545_v48  ;;  %v890_v53 = vpack.c.bf16 %v561_v49, %v561_v49  ;;  %v939_v54 = vpop.f32.mrb[12].mxu0  ;;  %v955_v55 = vpop.f32.mrb[12].mxu1 }
 0x102   : > { %708 = vst.msk [vmem:[%s1099_s4 + $0x2c] sm:$0xf] %vm696_vm1, %v876_v50  ;;  %724 = vst.msk [vmem:[%s1099_s4 + $0x6c] sm:$0xf] %vm696_vm1, %v892_v51  ;;  %v466_v56 = vadd.f32 %v939_v54, %v1086_v20  ;;  %v530_v57 = vadd.f32 %v955_v55, %v1086_v20  ;;  %v457_v58 = vpop.f32.mrb[13].mxu0  ;;  %v521_v59 = vpop.f32.mrb[13].mxu1 }
 0x103   : > { %706 = vst.msk [vmem:[%s1099_s4 + $0x24] sm:$0xf] %vm696_vm1, %v874_v52  ;;  %722 = vst.msk [vmem:[%s1099_s4 + $0x64] sm:$0xf] %vm696_vm1, %v890_v53  ;;  %v458_v60 = vadd.f32 %v1086_v20, %v457_v58  ;;  %v522_v61 = vadd.f32 %v1086_v20, %v521_v59  ;;  %v940_v62 = vpop.f32.mrb[14].mxu0  ;;  %v956_v63 = vpop.f32.mrb[14].mxu1 }
 0x104   : > { %v550_v0 = vmax.f32 %v466_v56, 0.0  ;;  %v566_v1 = vmax.f32 %v530_v57, 0.0  ;;  %v469_v2 = vadd.f32 %v940_v62, %v1086_v20  ;;  %v533_v3 = vadd.f32 %v956_v63, %v1086_v20  ;;  %v460_v4 = vpop.f32.mrb[15].mxu0  ;;  %v524_v5 = vpop.f32.mrb[15].mxu1 }
 0x105   : > { %v548_v6 = vmax.f32 %v458_v60, 0.0  ;;  %v564_v7 = vmax.f32 %v522_v61, 0.0  ;;  %v461_v8 = vadd.f32 %v1086_v20, %v460_v4  ;;  %v525_v9 = vadd.f32 %v1086_v20, %v524_v5 }
 0x106   : > { %v879_v10 = vpack.c.bf16 %v550_v0, %v550_v0  ;;  %v895_v11 = vpack.c.bf16 %v566_v1, %v566_v1  ;;  %v551_v12 = vmax.f32 %v469_v2, 0.0  ;;  %v567_v13 = vmax.f32 %v533_v3, 0.0 }
 0x107   : > { %v877_v14 = vpack.c.bf16 %v548_v6, %v548_v6  ;;  %v893_v15 = vpack.c.bf16 %v564_v7, %v564_v7  ;;  %v549_v16 = vmax.f32 %v461_v8, 0.0  ;;  %v565_v17 = vmax.f32 %v525_v9, 0.0 }
 0x108   : > { %711 = vst.msk [vmem:[%s1099_s4 + $0x38] sm:$0xf] %vm696_vm1, %v879_v10  ;;  %727 = vst.msk [vmem:[%s1099_s4 + $0x78] sm:$0xf] %vm696_vm1, %v895_v11  ;;  %v880_v18 = vpack.c.bf16 %v551_v12, %v551_v12  ;;  %v896_v19 = vpack.c.bf16 %v567_v13, %v567_v13 }
 0x109   : > { %709 = vst.msk [vmem:[%s1099_s4 + $0x30] sm:$0xf] %vm696_vm1, %v877_v14  ;;  %725 = vst.msk [vmem:[%s1099_s4 + $0x70] sm:$0xf] %vm696_vm1, %v893_v15  ;;  %v878_v20 = vpack.c.bf16 %v549_v16, %v549_v16  ;;  %v894_v21 = vpack.c.bf16 %v565_v17, %v565_v17 }
 0x10a   : > { %712 = vst.msk [vmem:[%s1099_s4 + $0x3c] sm:$0xf] %vm696_vm1, %v880_v18  ;;  %728 = vst.msk [vmem:[%s1099_s4 + $0x7c] sm:$0xf] %vm696_vm1, %v896_v19 }
 0x10b   : > { %710 = vst.msk [vmem:[%s1099_s4 + $0x34] sm:$0xf] %vm696_vm1, %v878_v20  ;;  %726 = vst.msk [vmem:[%s1099_s4 + $0x74] sm:$0xf] %vm696_vm1, %v894_v21 }
 0x10c PF: > { %s13_s12 = sadd.s32 1, %s999_s12  }
 0x10d   : > { %p10_p4 = scmp.ge.s32.totalorder %s13_s12, 4  }
 0x10f   :  { %12 = sbr.rel (!%p10_p4) target bundleno = 1 (0x1), region = 62 }

// kernel: net_forward.5
= control target key start
LH: loop header
LB: loop body
LE: loop exit
PB: predicated region body
PF: predicated region fallthrough
CT: control target
= control target key end

     0   :  { %vm580_vm0 = vcmask 519168   ;;  %s1037_s1 = inlined_call_operand.vmem [shape: bf16[512,64], index: 1, kind: input, shape index: {}]   ;;  %s1038_s0 = inlined_call_operand.vmem [shape: bf16[72,512], index: 0, kind: input, shape index: {}]   ;;  %s1039_s2 = inlined_call_operand.vmem [shape: f32[1,64], index: 2, kind: input, shape index: {}]   ;;  %s1040_s3 = inlined_call_operand.vmem [shape: bf16[72,64], index: 3, kind: output, shape index: {}]  }
   0x1   :  { %v757_v0 = vld [vmem:[%s1037_s1 + $0x40] sm:$0xff]   ;;  %v761_v4 = vld [vmem:[%s1037_s1 + $0x48] sm:$0xff]   ;;  %v765_v8 = vld [vmem:[%s1037_s1 + $0x50] sm:$0xff]  }
   0x2   :  { %v758_v1 = vld [vmem:[%s1037_s1 + $0xc0] sm:$0xff]   ;;  %665 = vmatprep.subr.bf16.mxu0 %v757_v0  ;;  %v762_v5 = vld [vmem:[%s1037_s1 + $0xc8] sm:$0xff]   ;;  %v766_v9 = vld [vmem:[%s1037_s1 + $0xd0] sm:$0xff]  }
   0x3   :  { %v759_v2 = vld [vmem:[%s1037_s1] sm:$0xff]   ;;  %711 = vmatprep.subr.bf16.mxu1 %v758_v1  ;;  %v763_v6 = vld [vmem:[%s1037_s1 + $0x8] sm:$0xff]   ;;  %v767_v10 = vld [vmem:[%s1037_s1 + $0x10] sm:$0xff]  }
   0x4   :  { %v760_v3 = vld [vmem:[%s1037_s1 + $0x80] sm:$0xff]   ;;  %666 = vmatpush3.bf16.msra.mxu0 %v759_v2  ;;  %v764_v7 = vld [vmem:[%s1037_s1 + $0x88] sm:$0xff]   ;;  %v768_v11 = vld [vmem:[%s1037_s1 + $0x90] sm:$0xff]  }
   0x5   :  { %712 = vmatpush3.bf16.msra.mxu1 %v760_v3  ;;  %667 = vmatprep.subr.bf16.mxu0 %v761_v4  ;;  %v769_v12 = vld [vmem:[%s1037_s1 + $0x58] sm:$0xff]   ;;  %v773_v16 = vld [vmem:[%s1037_s1 + $0x60] sm:$0xff]   ;;  %v777_v20 = vld [vmem:[%s1037_s1 + $0x68] sm:$0xff]  }
   0x6   :  { %713 = vmatprep.subr.bf16.mxu1 %v762_v5  ;;  %v770_v13 = vld [vmem:[%s1037_s1 + $0xd8] sm:$0xff]   ;;  %v774_v17 = vld [vmem:[%s1037_s1 + $0xe0] sm:$0xff]   ;;  %v778_v21 = vld [vmem:[%s1037_s1 + $0xe8] sm:$0xff]  }
   0x7   :  { %v771_v14 = vld [vmem:[%s1037_s1 + $0x18] sm:$0xff]   ;;  %v775_v18 = vld [vmem:[%s1037_s1 + $0x20] sm:$0xff]   ;;  %v779_v22 = vld [vmem:[%s1037_s1 + $0x28] sm:$0xff]  }
   0x8   :  { %668 = vmatpush3.bf16.msra.mxu0 %v763_v6  ;;  %v772_v15 = vld [vmem:[%s1037_s1 + $0x98] sm:$0xff]   ;;  %v776_v19 = vld [vmem:[%s1037_s1 + $0xa0] sm:$0xff]   ;;  %v780_v23 = vld [vmem:[%s1037_s1 + $0xa8] sm:$0xff]  }
   0x9   :  { %714 = vmatpush3.bf16.msra.mxu1 %v764_v7  ;;  %669 = vmatprep.subr.bf16.mxu0 %v765_v8  ;;  %v781_v24 = vld [vmem:[%s1037_s1 + $0x70] sm:$0xff]   ;;  %v785_v28 = vld [vmem:[%s1037_s1 + $0x78] sm:$0xff]   ;;  %v31_v46 = vld [vmem:[%s1038_s0 + $0x80] sm:$0xff] }
   0xa   :  { %715 = vmatprep.subr.bf16.mxu1 %v766_v9  ;;  %v782_v25 = vld [vmem:[%s1037_s1 + $0xf0] sm:$0xff]   ;;  %v786_v29 = vld [vmem:[%s1037_s1 + $0xf8] sm:$0xff]   ;;  %v32_v47 = vld [vmem:[%s1038_s0 + $0x88] sm:$0xff]  ;;  %v612_v50 = vcombine.high %v31_v46, %v31_v46  ;;  %v611_v52 = vcombine.low %v31_v46, %v31_v46 }
   0xb   :  { %v783_v26 = vld [vmem:[%s1037_s1 + $0x30] sm:$0xff]   ;;  %v787_v30 = vld [vmem:[%s1037_s1 + $0x38] sm:$0xff]   ;;  %v614_v51 = vcombine.high %v32_v47, %v32_v47  ;;  %v613_v53 = vcombine.low %v32_v47, %v32_v47  ;;  %v990_v56 = vld [vmem:[%s1039_s2] ss:$0 sm:$0xff] }
   0xc   :  { %670 = vmatpush3.bf16.msra.mxu0 %v767_v10  ;;  %v784_v27 = vld [vmem:[%s1037_s1 + $0xb0] sm:$0xff]   ;;  %v788_v31 = vld [vmem:[%s1037_s1 + $0xb8] sm:$0xff]  }
   0xd   :  { %716 = vmatpush3.bf16.msra.mxu1 %v768_v11  ;;  %671 = vmatprep.subr.bf16.mxu0 %v769_v12  ;;  %v789_v32 = vld [vmem:[%s1038_s0] ss:$16 sps:$4 sm:$0xff]   ;;  %v791_v33 = vld [vmem:[%s1038_s0 + $0x4] ss:$16 sps:$4 sm:$0xff]   ;;  %v792_v34 = vld [vmem:[%s1038_s0 + $0x8] ss:$16 sps:$4 sm:$0xff]  }
   0xe   :  { %717 = vmatprep.subr.bf16.mxu1 %v770_v13  ;;  %v794_v35 = vld [vmem:[%s1038_s0 + $0xc] ss:$16 sps:$4 sm:$0xff]   ;;  %422 = vmatprep.mubr.bf16.mxu0 %v791_v33  ;;  %v795_v36 = vld [vmem:[%s1038_s0 + $0x24] ss:$16 sps:$4 sm:$0xff]   ;;  %v799_v38 = vld [vmem:[%s1038_s0 + $0x20] ss:$16 sps:$4 sm:$0xff]  }
   0xf   :  { %494 = vmatprep.mubr.bf16.mxu1 %v794_v35  ;;  %v797_v37 = vld [vmem:[%s1038_s0 + $0x2c] ss:$16 sps:$4 sm:$0xff]   ;;  %v800_v39 = vld [vmem:[%s1038_s0 + $0x28] ss:$16 sps:$4 sm:$0xff]   ;;  %v801_v40 = vld [vmem:[%s1038_s0 + $0x44] ss:$16 sps:$4 sm:$0xff]  }
  0x10   :  { %672 = vmatpush3.bf16.msra.mxu0 %v771_v14  ;;  %v803_v41 = vld [vmem:[%s1038_s0 + $0x4c] ss:$16 sps:$4 sm:$0xff]   ;;  %v805_v42 = vld [vmem:[%s1038_s0 + $0x40] ss:$16 sps:$4 sm:$0xff]   ;;  %v806_v43 = vld [vmem:[%s1038_s0 + $0x48] ss:$16 sps:$4 sm:$0xff]  }
  0x11   :  { %718 = vmatpush3.bf16.msra.mxu1 %v772_v15  ;;  %673 = vmatprep.subr.bf16.mxu0 %v773_v16  ;;  %v807_v44 = vld [vmem:[%s1038_s0 + $0x64] ss:$16 sps:$4 sm:$0xff]   ;;  %v809_v45 = vld [vmem:[%s1038_s0 + $0x6c] ss:$16 sps:$4 sm:$0xff]   ;;  %v811_v48 = vld [vmem:[%s1038_s0 + $0x60] ss:$16 sps:$4 sm:$0xff]  }
  0x12   :  { %719 = vmatprep.subr.bf16.mxu1 %v774_v17  ;;  %v812_v49 = vld [vmem:[%s1038_s0 + $0x68] ss:$16 sps:$4 sm:$0xff]  }
  0x14   :  { %674 = vmatpush3.bf16.msra.mxu0 %v775_v18 }
  0x15   :  { %720 = vmatpush3.bf16.msra.mxu1 %v776_v19  ;;  %675 = vmatprep.subr.bf16.mxu0 %v777_v20 }
  0x16   :  { %721 = vmatprep.subr.bf16.mxu1 %v778_v21 }
  0x18   :  { %676 = vmatpush3.bf16.msra.mxu0 %v779_v22 }
  0x19   :  { %722 = vmatpush3.bf16.msra.mxu1 %v780_v23  ;;  %677 = vmatprep.subr.bf16.mxu0 %v781_v24 }
  0x1a   :  { %723 = vmatprep.subr.bf16.mxu1 %v782_v25 }
  0x1c   :  { %678 = vmatpush3.bf16.msra.mxu0 %v783_v26 }
  0x1d   :  { %724 = vmatpush3.bf16.msra.mxu1 %v784_v27  ;;  %679 = vmatprep.subr.bf16.mxu0 %v785_v28 }
  0x1e   :  { %725 = vmatprep.subr.bf16.mxu1 %v786_v29 }
  0x20   :  { %680 = vmatpush3.bf16.msra.mxu0 %v787_v30 }
  0x21   :  { %726 = vmatpush3.bf16.msra.mxu1 %v788_v31 }
  0x23   :  { %423 = vmatmul.mubr.bf16.vlgmr.msra.gmra.mrb[0].mxu0 %v789_v32 }
  0x24   :  { %495 = vmatmul.mubr.bf16.vlgmr.msra.gmra.mrb[0].mxu1 %v792_v34  ;;  %430 = vmatprep.mubr.bf16.mxu0 %v795_v36 }
  0x25   :  { %502 = vmatprep.mubr.bf16.mxu1 %v797_v37 }
  0x2b   :  { %431 = vmatmul.mubr.bf16.gmra.mrb[4].mxu0 %v799_v38 }
  0x2c   :  { %503 = vmatmul.mubr.bf16.gmra.mrb[4].mxu1 %v800_v39  ;;  %438 = vmatprep.mubr.bf16.mxu0 %v801_v40 }
  0x2d   :  { %510 = vmatprep.mubr.bf16.mxu1 %v803_v41 }
  0x33   :  { %439 = vmatmul.mubr.bf16.gmra.mrb[8].mxu0 %v805_v42 }
  0x34   :  { %511 = vmatmul.mubr.bf16.gmra.mrb[8].mxu1 %v806_v43  ;;  %446 = vmatprep.mubr.bf16.mxu0 %v807_v44 }
  0x35   :  { %518 = vmatprep.mubr.bf16.mxu1 %v809_v45 }
  0x3b   :  { %447 = vmatmul.mubr.bf16.gmra.mrb[12].mxu0 %v811_v48 }
  0x3c   :  { %519 = vmatmul.mubr.bf16.gmra.mrb[12].mxu1 %v812_v49  ;;  %454 = vmatprep.mubr.bf16.mxu0 %v612_v50 }
  0x3d   :  { %526 = vmatprep.mubr.bf16.mxu1 %v614_v51 }
  0x43   :  { %455 = vmatmul.mubr.bf16.gmra.mrb[16].mxu0 %v611_v52 }
  0x44   :  { %527 = vmatmul.mubr.bf16.gmra.mrb[16].mxu1 %v613_v53 }
  0xf6   :  { %v681_v54 = vpop.f32.mrb[0].mxu0 }
  0xf7   :  { %v727_v55 = vpop.f32.mrb[0].mxu1  ;;  %v682_v57 = vpop.f32.mrb[1].mxu0 }
  0xf8   :  { %v683_v58 = vadd.f32 %v682_v57, %v681_v54  ;;  %v728_v59 = vpop.f32.mrb[1].mxu1  ;;  %v684_v60 = vpop.f32.mrb[2].mxu0 }
  0xf9   :  { %v729_v61 = vadd.f32 %v728_v59, %v727_v55  ;;  %v730_v62 = vpop.f32.mrb[2].mxu1  ;;  %v685_v63 = vpop.f32.mrb[3].mxu0 }
  0xfa   :  { %v425_v0 = vadd.f32 %v683_v58, %v990_v56  ;;  %v686_v1 = vadd.f32 %v685_v63, %v684_v60  ;;  %v731_v2 = vpop.f32.mrb[3].mxu1 }
  0xfb   :  { %v732_v3 = vadd.f32 %v731_v2, %v730_v62 }
  0xfc   :  { %v497_v4 = vadd.f32 %v729_v61, %v425_v0  ;;  %v428_v5 = vadd.f32 %v686_v1, %v990_v56 }
  0xfe   :  { %v534_v6 = vmax.f32 %v497_v4, 0.0  ;;  %v500_v7 = vadd.f32 %v732_v3, %v428_v5  ;;  %v687_v8 = vpop.f32.mrb[4].mxu0 }
  0xff   :  { %v733_v9 = vpop.f32.mrb[4].mxu1  ;;  %v688_v10 = vpop.f32.mrb[5].mxu0 }
 0x100   :  { %v656_v11 = vpack.c.bf16 %v534_v6, %v534_v6  ;;  %v535_v12 = vmax.f32 %v500_v7, 0.0  ;;  %v689_v13 = vadd.f32 %v688_v10, %v687_v8  ;;  %v734_v14 = vpop.f32.mrb[5].mxu1  ;;  %v690_v15 = vpop.f32.mrb[6].mxu0 }
 0x101   :  { %v735_v16 = vadd.f32 %v734_v14, %v733_v9  ;;  %v736_v17 = vpop.f32.mrb[6].mxu1  ;;  %v691_v18 = vpop.f32.mrb[7].mxu0 }
 0x102   :  { %581 = vst.msk [vmem:[%s1040_s3] sm:$0xf] %vm580_vm0, %v656_v11  ;;  %v657_v19 = vpack.c.bf16 %v535_v12, %v535_v12  ;;  %v433_v20 = vadd.f32 %v689_v13, %v990_v56  ;;  %v692_v21 = vadd.f32 %v691_v18, %v690_v15  ;;  %v737_v22 = vpop.f32.mrb[7].mxu1 }
 0x103   :  { %v738_v23 = vadd.f32 %v737_v22, %v736_v17 }
 0x104   :  { %582 = vst.msk [vmem:[%s1040_s3 + $0x4] sm:$0xf] %vm580_vm0, %v657_v19  ;;  %v505_v24 = vadd.f32 %v735_v16, %v433_v20  ;;  %v436_v25 = vadd.f32 %v692_v21, %v990_v56 }
 0x106   :  { %v536_v26 = vmax.f32 %v505_v24, 0.0  ;;  %v508_v27 = vadd.f32 %v738_v23, %v436_v25  ;;  %v693_v28 = vpop.f32.mrb[8].mxu0 }
 0x107   :  { %v739_v29 = vpop.f32.mrb[8].mxu1  ;;  %v694_v30 = vpop.f32.mrb[9].mxu0 }
 0x108   :  { %v658_v31 = vpack.c.bf16 %v536_v26, %v536_v26  ;;  %v537_v32 = vmax.f32 %v508_v27, 0.0  ;;  %v695_v33 = vadd.f32 %v694_v30, %v693_v28  ;;  %v740_v34 = vpop.f32.mrb[9].mxu1  ;;  %v696_v35 = vpop.f32.mrb[10].mxu0 }
 0x109   :  { %v741_v36 = vadd.f32 %v740_v34, %v739_v29  ;;  %v742_v37 = vpop.f32.mrb[10].mxu1  ;;  %v697_v38 = vpop.f32.mrb[11].mxu0 }
 0x10a   :  { %583 = vst.msk [vmem:[%s1040_s3 + $0x8] sm:$0xf] %vm580_vm0, %v658_v31  ;;  %v659_v39 = vpack.c.bf16 %v537_v32, %v537_v32  ;;  %v441_v40 = vadd.f32 %v695_v33, %v990_v56  ;;  %v698_v41 = vadd.f32 %v697_v38, %v696_v35  ;;  %v743_v42 = vpop.f32.mrb[11].mxu1 }
 0x10b   :  { %v744_v43 = vadd.f32 %v743_v42, %v742_v37 }
 0x10c   :  { %584 = vst.msk [vmem:[%s1040_s3 + $0xc] sm:$0xf] %vm580_vm0, %v659_v39  ;;  %v513_v44 = vadd.f32 %v741_v36, %v441_v40  ;;  %v444_v45 = vadd.f32 %v698_v41, %v990_v56 }
 0x10e   :  { %v538_v46 = vmax.f32 %v513_v44, 0.0  ;;  %v516_v47 = vadd.f32 %v744_v43, %v444_v45  ;;  %v699_v48 = vpop.f32.mrb[12].mxu0 }
 0x10f   :  { %v745_v49 = vpop.f32.mrb[12].mxu1  ;;  %v700_v50 = vpop.f32.mrb[13].mxu0 }
 0x110   :  { %v660_v51 = vpack.c.bf16 %v538_v46, %v538_v46  ;;  %v539_v52 = vmax.f32 %v516_v47, 0.0  ;;  %v701_v53 = vadd.f32 %v700_v50, %v699_v48  ;;  %v746_v54 = vpop.f32.mrb[13].mxu1  ;;  %v702_v55 = vpop.f32.mrb[14].mxu0 }
 0x111   :  { %v747_v57 = vadd.f32 %v746_v54, %v745_v49  ;;  %v748_v58 = vpop.f32.mrb[14].mxu1  ;;  %v703_v59 = vpop.f32.mrb[15].mxu0 }
 0x112   :  { %585 = vst.msk [vmem:[%s1040_s3 + $0x10] sm:$0xf] %vm580_vm0, %v660_v51  ;;  %v661_v60 = vpack.c.bf16 %v539_v52, %v539_v52  ;;  %v449_v61 = vadd.f32 %v701_v53, %v990_v56  ;;  %v704_v62 = vadd.f32 %v703_v59, %v702_v55  ;;  %v749_v63 = vpop.f32.mrb[15].mxu1 }
 0x113   :  { %v750_v0 = vadd.f32 %v749_v63, %v748_v58 }
 0x114   :  { %586 = vst.msk [vmem:[%s1040_s3 + $0x14] sm:$0xf] %vm580_vm0, %v661_v60  ;;  %v521_v1 = vadd.f32 %v747_v57, %v449_v61  ;;  %v452_v2 = vadd.f32 %v704_v62, %v990_v56 }
 0x116   :  { %v540_v3 = vmax.f32 %v521_v1, 0.0  ;;  %v524_v4 = vadd.f32 %v750_v0, %v452_v2  ;;  %v705_v5 = vpop.f32.mrb[16].mxu0 }
 0x117   :  { %v751_v6 = vpop.f32.mrb[16].mxu1  ;;  %v706_v7 = vpop.f32.mrb[17].mxu0 }
 0x118   :  { %v662_v8 = vpack.c.bf16 %v540_v3, %v540_v3  ;;  %v541_v9 = vmax.f32 %v524_v4, 0.0  ;;  %v707_v10 = vadd.f32 %v706_v7, %v705_v5  ;;  %v752_v11 = vpop.f32.mrb[17].mxu1  ;;  %v708_v12 = vpop.f32.mrb[18].mxu0 }
 0x119   :  { %v753_v13 = vadd.f32 %v752_v11, %v751_v6  ;;  %v754_v14 = vpop.f32.mrb[18].mxu1  ;;  %v709_v15 = vpop.f32.mrb[19].mxu0 }
 0x11a   :  { %587 = vst.msk [vmem:[%s1040_s3 + $0x18] sm:$0xf] %vm580_vm0, %v662_v8  ;;  %v663_v16 = vpack.c.bf16 %v541_v9, %v541_v9  ;;  %v457_v17 = vadd.f32 %v707_v10, %v990_v56  ;;  %v755_v18 = vpop.f32.mrb[19].mxu1 }
 0x11c   :  { %588 = vst.msk [vmem:[%s1040_s3 + $0x1c] sm:$0xf] %vm580_vm0, %v663_v16  ;;  %v529_v19 = vadd.f32 %v753_v13, %v457_v17 }
 0x11e   :  { %v542_v20 = vmax.f32 %v529_v19, 0.0 }
 0x120   :  { %v664_v21 = vpack.c.bf16 %v542_v20, %v542_v20 }
 0x122   :  { %589 = vst.msk [vmem:[%s1040_s3 + $0x20] sm:$0xf] %vm580_vm0, %v664_v21 }

// kernel: net_forward.6
= control target key start
LH: loop header
LB: loop body
LE: loop exit
PB: predicated region body
PF: predicated region fallthrough
CT: control target
= control target key end

     0   :  { %vm372_vm0 = vcmask 523264   ;;  %vm542_vm1 = vcmask 257024   ;;  %s905_s1 = inlined_call_operand.vmem [shape: bf16[576,32], index: 1, kind: input, shape index: {}]   ;;  %s906_s0 = inlined_call_operand.vmem [shape: bf16[32,576], index: 0, kind: input, shape index: {}]   ;;  %s907_s2 = inlined_call_operand.vmem [shape: f32[1,32], index: 2, kind: input, shape index: {}]   ;;  %s908_s3 = inlined_call_operand.vmem [shape: bf16[32,32], index: 3, kind: output, shape index: {}]  }
   0x1   :  { %v682_v0 = vld [vmem:[%s905_s1 + $0x40] sm:$0xff]   ;;  %v686_v4 = vld [vmem:[%s905_s1 + $0x48] sm:$0xff]   ;;  %v690_v8 = vld [vmem:[%s905_s1 + $0x50] sm:$0xff]  }
   0x2   :  { %v683_v1 = vld [vmem:[%s905_s1] sm:$0xff]   ;;  %608 = vmatprep.subr.bf16.mxu0 %v682_v0  ;;  %v687_v5 = vld [vmem:[%s905_s1 + $0x8] sm:$0xff]   ;;  %v691_v9 = vld [vmem:[%s905_s1 + $0x10] sm:$0xff]  }
   0x3   :  { %v684_v2 = vld [vmem:[%s905_s1 + $0xc0] sm:$0xff]   ;;  %609 = vmatpush3.bf16.msra.mxu0 %v683_v1  ;;  %v688_v6 = vld [vmem:[%s905_s1 + $0xc8] sm:$0xff]   ;;  %v692_v10 = vld [vmem:[%s905_s1 + $0xd0] sm:$0xff]  }
   0x4   :  { %v685_v3 = vld [vmem:[%s905_s1 + $0x80] sm:$0xff]   ;;  %636 = vmatprep.subr.bf16.mxu1 %v684_v2  ;;  %610 = vmatprep.subr.bf16.mxu0 %v686_v4  ;;  %v689_v7 = vld [vmem:[%s905_s1 + $0x88] sm:$0xff]   ;;  %v693_v11 = vld [vmem:[%s905_s1 + $0x90] sm:$0xff]  }
   0x5   :  { %637 = vmatpush3.bf16.msra.mxu1 %v685_v3  ;;  %v694_v12 = vld [vmem:[%s905_s1 + $0x58] sm:$0xff]   ;;  %v698_v16 = vld [vmem:[%s905_s1 + $0x60] sm:$0xff]   ;;  %v702_v20 = vld [vmem:[%s905_s1 + $0x68] sm:$0xff]  }
   0x6   :  { %638 = vmatprep.subr.bf16.mxu1 %v688_v6  ;;  %v695_v13 = vld [vmem:[%s905_s1 + $0x18] sm:$0xff]   ;;  %v699_v17 = vld [vmem:[%s905_s1 + $0x20] sm:$0xff]   ;;  %v703_v21 = vld [vmem:[%s905_s1 + $0x28] sm:$0xff]  }
   0x7   :  { %611 = vmatpush3.bf16.msra.mxu0 %v687_v5  ;;  %v696_v14 = vld [vmem:[%s905_s1 + $0xd8] sm:$0xff]   ;;  %v700_v18 = vld [vmem:[%s905_s1 + $0xe0] sm:$0xff]   ;;  %v704_v22 = vld [vmem:[%s905_s1 + $0xe8] sm:$0xff]  }
   0x8   :  { %612 = vmatprep.subr.bf16.mxu0 %v690_v8  ;;  %v697_v15 = vld [vmem:[%s905_s1 + $0x98] sm:$0xff]   ;;  %v701_v19 = vld [vmem:[%s905_s1 + $0xa0] sm:$0xff]   ;;  %v705_v23 = vld [vmem:[%s905_s1 + $0xa8] sm:$0xff]  }
   0x9   :  { %639 = vmatpush3.bf16.msra.mxu1 %v689_v7  ;;  %v706_v24 = vld [vmem:[%s905_s1 + $0x70] sm:$0xff]   ;;  %v710_v28 = vld [vmem:[%s905_s1 + $0x78] sm:$0xff]   ;;  %v717_v34 = vld [vmem:[%s905_s1 + $0x100] sm:$0xff]  }
   0xa   :  { %640 = vmatprep.subr.bf16.mxu1 %v692_v10  ;;  %v707_v25 = vld [vmem:[%s905_s1 + $0x30] sm:$0xff]   ;;  %v711_v29 = vld [vmem:[%s905_s1 + $0x38] sm:$0xff]   ;;  %v720_v36 = vld [vmem:[%s906_s0 + $0xc] ss:$20 sps:$4 sm:$0xff]  }
   0xb   :  { %613 = vmatpush3.bf16.msra.mxu0 %v691_v9  ;;  %v708_v26 = vld [vmem:[%s905_s1 + $0xf0] sm:$0xff]   ;;  %v712_v30 = vld [vmem:[%s905_s1 + $0xf8] sm:$0xff]   ;;  %v721_v37 = vld [vmem:[%s905_s1 + $0x108] sm:$0xff]   ;;  %460 = vmatprep.mubr.bf16.mxu1 %v720_v36 }
   0xc   :  { %614 = vmatprep.subr.bf16.mxu0 %v694_v12  ;;  %v709_v27 = vld [vmem:[%s905_s1 + $0xb0] sm:$0xff]   ;;  %v715_v32 = vld [vmem:[%s906_s0 + $0x4] ss:$20 sps:$4 sm:$0xff]   ;;  %v718_v35 = vld [vmem:[%s906_s0 + $0x8] ss:$20 sps:$4 sm:$0xff]  }
   0xd   :  { %641 = vmatpush3.bf16.msra.mxu1 %v693_v11  ;;  %v713_v31 = vld [vmem:[%s906_s0] ss:$20 sps:$4 sm:$0xff]   ;;  %v716_v33 = vld [vmem:[%s905_s1 + $0xb8] sm:$0xff]   ;;  %411 = vmatprep.mubr.bf16.mxu0 %v715_v32  ;;  %v728_v42 = vld [vmem:[%s906_s0 + $0x30] ss:$20 sps:$4 sm:$0xff]  }
   0xe   :  { %642 = vmatprep.subr.bf16.mxu1 %v696_v14  ;;  %v722_v38 = vld [vmem:[%s906_s0 + $0x2c] ss:$20 sps:$4 sm:$0xff]   ;;  %v724_v39 = vld [vmem:[%s906_s0 + $0x28] ss:$20 sps:$4 sm:$0xff]   ;;  %v725_v40 = vld [vmem:[%s905_s1 + $0x110] sm:$0xff]  }
   0xf   :  { %615 = vmatpush3.bf16.msra.mxu0 %v695_v13  ;;  %v726_v41 = vld [vmem:[%s906_s0 + $0x34] ss:$20 sps:$4 sm:$0xff]   ;;  %v729_v43 = vld [vmem:[%s905_s1 + $0x118] sm:$0xff]   ;;  %v730_v44 = vld [vmem:[%s906_s0 + $0x10] ss:$20 sps:$4 sm:$0xff]  }
  0x10   :  { %616 = vmatprep.subr.bf16.mxu0 %v698_v16  ;;  %v731_v45 = vld [vmem:[%s906_s0 + $0x38] ss:$20 sps:$4 sm:$0xff]   ;;  %v551_v47 = vld [vmem:[%s907_s2] ss:$0 sm:$0xff] }
  0x11   :  { %643 = vmatpush3.bf16.msra.mxu1 %v697_v15 }
  0x12   :  { %644 = vmatprep.subr.bf16.mxu1 %v700_v18 }
  0x13   :  { %617 = vmatpush3.bf16.msra.mxu0 %v699_v17 }
  0x14   :  { %618 = vmatprep.subr.bf16.mxu0 %v702_v20 }
  0x15   :  { %645 = vmatpush3.bf16.msra.mxu1 %v701_v19 }
  0x16   :  { %646 = vmatprep.subr.bf16.mxu1 %v704_v22 }
  0x17   :  { %619 = vmatpush3.bf16.msra.mxu0 %v703_v21 }
  0x18   :  { %620 = vmatprep.subr.bf16.mxu0 %v706_v24 }
  0x19   :  { %647 = vmatpush3.bf16.msra.mxu1 %v705_v23 }
  0x1a   :  { %648 = vmatprep.subr.bf16.mxu1 %v708_v26 }
  0x1b   :  { %621 = vmatpush3.bf16.msra.mxu0 %v707_v25 }
  0x1c   :  { %622 = vmatprep.subr.bf16.mxu0 %v710_v28 }
  0x1d   :  { %649 = vmatpush3.bf16.msra.mxu1 %v709_v27 }
  0x1e   :  { %650 = vmatprep.subr.bf16.mxu1 %v712_v30 }
  0x1f   :  { %623 = vmatpush3.bf16.msra.mxu0 %v711_v29 }
  0x20   :  { %670 = vmatprep.subr.bf16.mxu0 %v717_v34 }
  0x21   :  { %651 = vmatpush3.bf16.msra.mxu1 %v716_v33 }
  0x22   :  { %412 = vmatmul.mubr.bf16.vlgmr.msra.gmra.mrb[0].mxu0 %v713_v31 }
  0x23   :  { %671 = vmatpush3.bf16.msra.mxu0 %v717_v34  ;;  %419 = vmatprep.mubr.bf16.mxu0 %v722_v38 }
  0x24   :  { %461 = vmatmul.mubr.bf16.vlgmr.msra.gmra.mrb[0].mxu1 %v718_v35  ;;  %672 = vmatprep.subr.bf16.mxu0 %v721_v37 }
  0x25   :  { %468 = vmatprep.mubr.bf16.mxu1 %v726_v41 }
  0x27   :  { %673 = vmatpush3.bf16.msra.mxu0 %v721_v37 }
  0x28   :  { %674 = vmatprep.subr.bf16.mxu0 %v725_v40 }
  0x2a   :  { %420 = vmatmul.mubr.bf16.gmra.mrb[4].mxu0 %v724_v39 }
  0x2b   :  { %678 = vmatprep.mubr.msk.bf16.mxu0 %vm372_vm0, %v730_v44  ;;  %675 = vmatpush3.bf16.msra.mxu0 %v725_v40 }
  0x2c   :  { %469 = vmatmul.mubr.bf16.gmra.mrb[4].mxu1 %v728_v42  ;;  %676 = vmatprep.subr.bf16.mxu0 %v729_v43 }
  0x2f   :  { %677 = vmatpush3.bf16.msra.mxu0 %v729_v43 }
  0x32   :  { %679 = vmatmul.mubr.msk.bf16.vlgmr.msra.gmra.mrb[8].mxu0 %vm372_vm0, %v731_v45 }
  0xf5   :  { %v624_v46 = vpop.f32.mrb[0].mxu0 }
  0xf6   :  { %v625_v48 = vpop.f32.mrb[1].mxu0 }
  0xf7   :  { %v626_v49 = vadd.f32 %v625_v48, %v624_v46  ;;  %v627_v50 = vpop.f32.mrb[2].mxu0  ;;  %v652_v51 = vpop.f32.mrb[0].mxu1 }
  0xf8   :  { %v628_v52 = vpop.f32.mrb[3].mxu0  ;;  %v653_v55 = vpop.f32.mrb[1].mxu1 }
  0xf9   :  { %v414_v53 = vadd.f32 %v626_v49, %v551_v47  ;;  %v629_v54 = vadd.f32 %v628_v52, %v627_v50  ;;  %v654_v56 = vadd.f32 %v653_v55, %v652_v51  ;;  %v655_v57 = vpop.f32.mrb[2].mxu1 }
  0xfa   :  { %v656_v59 = vpop.f32.mrb[3].mxu1 }
  0xfb   :  { %v417_v58 = vadd.f32 %v629_v54, %v551_v47  ;;  %v657_v60 = vadd.f32 %v656_v59, %v655_v57  ;;  %v463_v61 = vadd.f32 %v654_v56, %v414_v53 }
  0xfd   :  { %v630_v62 = vpop.f32.mrb[4].mxu0  ;;  %v466_v0 = vadd.f32 %v657_v60, %v417_v58 }
  0xfe   :  { %v631_v63 = vpop.f32.mrb[5].mxu0 }
  0xff   :  { %v632_v1 = vadd.f32 %v631_v63, %v630_v62  ;;  %v633_v2 = vpop.f32.mrb[6].mxu0  ;;  %v658_v3 = vpop.f32.mrb[4].mxu1 }
 0x100   :  { %v634_v4 = vpop.f32.mrb[7].mxu0  ;;  %v659_v7 = vpop.f32.mrb[5].mxu1 }
 0x101   :  { %v422_v5 = vadd.f32 %v632_v1, %v551_v47  ;;  %v635_v6 = vadd.f32 %v634_v4, %v633_v2  ;;  %v660_v8 = vadd.f32 %v659_v7, %v658_v3  ;;  %v661_v9 = vpop.f32.mrb[6].mxu1 }
 0x102   :  { %v662_v11 = vpop.f32.mrb[7].mxu1 }
 0x103   :  { %v425_v10 = vadd.f32 %v635_v6, %v551_v47  ;;  %v663_v12 = vadd.f32 %v662_v11, %v661_v9  ;;  %v471_v13 = vadd.f32 %v660_v8, %v422_v5 }
 0x105   :  { %v680_v14 = vpop.f32.mrb[8].mxu0  ;;  %v474_v15 = vadd.f32 %v663_v12, %v425_v10 }
 0x106   :  { %v520_v16 = vadd.f32 %v680_v14, %v471_v13  ;;  %v511_v17 = vpop.f32.mrb[9].mxu0 }
 0x107   :  { %v512_v18 = vadd.f32 %v511_v17, %v463_v61  ;;  %v681_v19 = vpop.f32.mrb[10].mxu0 }
 0x108   :  { %v606_v20 = vpack.c.bf16 %v520_v16, %v520_v16  ;;  %v523_v21 = vadd.f32 %v681_v19, %v474_v15  ;;  %v514_v22 = vpop.f32.mrb[11].mxu0 }
 0x109   :  { %v604_v23 = vpack.c.bf16 %v512_v18, %v512_v18  ;;  %v515_v24 = vadd.f32 %v514_v22, %v466_v0 }
 0x10a   :  { %545 = vst.msk [vmem:[%s908_s3 + $0x8] sm:$0xf] %vm542_vm1, %v606_v20  ;;  %v607_v25 = vpack.c.bf16 %v523_v21, %v523_v21 }
 0x10b   :  { %543 = vst.msk [vmem:[%s908_s3] sm:$0xf] %vm542_vm1, %v604_v23  ;;  %v605_v26 = vpack.c.bf16 %v515_v24, %v515_v24 }
 0x10c   :  { %546 = vst.msk [vmem:[%s908_s3 + $0xc] sm:$0xf] %vm542_vm1, %v607_v25 }
 0x10d   :  { %544 = vst.msk [vmem:[%s908_s3 + $0x4] sm:$0xf] %vm542_vm1, %v605_v26 }

// kernel: net_forward.7
= control target key start
LH: loop header
LB: loop body
LE: loop exit
PB: predicated region body
PF: predicated region fallthrough
CT: control target
= control target key end

     0   :  { %v1313_v1 = vmov 0   ;;  %vm430_vm0 = vcmask 1040384   ;;  %v1314_v42 = vmov 0.0   ;;  %vm1315_vm1 = vmmov 0   ;;  %s1637_s4 = inlined_call_operand.vmem [shape: bf16[512,32], index: 4, kind: input, shape index: {}]   ;;  %s1638_s0 = inlined_call_operand.vmem [shape: bf16[8,512], index: 0, kind: input, shape index: {}]   ;;  %s1639_s3 = inlined_call_operand.vmem [shape: f32[8,1], index: 3, kind: input, shape index: {}]   ;;  %s1640_s7 = inlined_call_operand.vmem [shape: bf16[3,2,32], index: 7, kind: input, shape index: {}]   ;;  %s1641_s1 = inlined_call_operand.vmem [shape: f32[8,2], index: 1, kind: input, shape index: {}]   ;;  %s1642_s6 = inlined_call_operand.vmem [shape: bf16[3,32,32], index: 6, kind: input, shape index: {}]   ;;  %s1643_s8 = inlined_call_operand.vmem [shape: bf16[3,32,32], index: 8, kind: input, shape index: {}]   ;;  %s1644_s5 = inlined_call_operand.vmem [shape: f32[1,32], index: 5, kind: input, shape index: {}]   ;;  %s1645_s2 = inlined_call_operand.vmem [shape: f32[8,32], index: 2, kind: input, shape index: {}]   ;;  %s1646_s12 = inlined_call_operand.<no memory space> [shape: f32[1,1], index: 12, kind: input, shape index: {}]   ;;  %s1647_s9 = inlined_call_operand.vmem [shape: f32[3,1,32], index: 9, kind: input, shape index: {}]   ;;  %s1648_s10 = inlined_call_operand.vmem [shape: f32[3,1,32], index: 10, kind: input, shape index: {}]   ;;  %s1649_s11 = inlined_call_operand.vmem [shape: f32[1,32], index: 11, kind: input, shape index: {}]   ;;  %s1650_s14 = inlined_call_operand.vmem [shape: f32[8,32], index: 14, kind: output, shape index: {1}]   ;;  %s1651_s13 = inlined_call_operand.vmem [shape: f32[8,1], index: 13, kind: output, shape index: {0}]  }
   0x1   :  { %v1255_v0 = vld [vmem:[%s1637_s4 + $0x40] sm:$0xff]   ;;  %1254 = vset.pattern.permute.xlu0 %v1313_v1  ;;  %v1259_v5 = vld [vmem:[%s1637_s4 + $0x48] sm:$0xff]   ;;  %v1263_v9 = vld [vmem:[%s1637_s4 + $0x50] sm:$0xff]   ;;  %vm426_vm2 = vcmask 15360   ;;  %vm486_vm3 = vcmask 261120   ;;  %vm997_vm4 = vcmask 7168  }
   0x2   :  { %v1256_v2 = vld [vmem:[%s1637_s4 + $0xc0] sm:$0xff]   ;;  %1097 = vmatprep.subr.bf16.mxu0 %v1255_v0  ;;  %v1260_v6 = vld [vmem:[%s1637_s4 + $0xc8] sm:$0xff]   ;;  %v1264_v10 = vld [vmem:[%s1637_s4 + $0xd0] sm:$0xff]  }
   0x3   :  { %v1257_v3 = vld [vmem:[%s1637_s4] sm:$0xff]   ;;  %1119 = vmatprep.subr.bf16.mxu1 %v1256_v2  ;;  %v1261_v7 = vld [vmem:[%s1637_s4 + $0x8] sm:$0xff]   ;;  %v1265_v11 = vld [vmem:[%s1637_s4 + $0x10] sm:$0xff]  }
   0x4   :  { %v1258_v4 = vld [vmem:[%s1637_s4 + $0x80] sm:$0xff]   ;;  %1098 = vmatpush3.bf16.msra.mxu0 %v1257_v3  ;;  %v1262_v8 = vld [vmem:[%s1637_s4 + $0x88] sm:$0xff]   ;;  %v1266_v12 = vld [vmem:[%s1637_s4 + $0x90] sm:$0xff]  }
   0x5   :  { %1120 = vmatpush3.bf16.msra.mxu1 %v1258_v4  ;;  %1099 = vmatprep.subr.bf16.mxu0 %v1259_v5  ;;  %v1267_v13 = vld [vmem:[%s1637_s4 + $0x58] sm:$0xff]   ;;  %v1271_v17 = vld [vmem:[%s1637_s4 + $0x60] sm:$0xff]   ;;  %v1275_v21 = vld [vmem:[%s1637_s4 + $0x68] sm:$0xff]  }
   0x6   :  { %1121 = vmatprep.subr.bf16.mxu1 %v1260_v6  ;;  %v1268_v14 = vld [vmem:[%s1637_s4 + $0xd8] sm:$0xff]   ;;  %v1272_v18 = vld [vmem:[%s1637_s4 + $0xe0] sm:$0xff]   ;;  %v1276_v22 = vld [vmem:[%s1637_s4 + $0xe8] sm:$0xff]  }
   0x7   :  { %v1269_v15 = vld [vmem:[%s1637_s4 + $0x18] sm:$0xff]   ;;  %v1273_v19 = vld [vmem:[%s1637_s4 + $0x20] sm:$0xff]   ;;  %v1277_v23 = vld [vmem:[%s1637_s4 + $0x28] sm:$0xff]  }
   0x8   :  { %1100 = vmatpush3.bf16.msra.mxu0 %v1261_v7  ;;  %v1270_v16 = vld [vmem:[%s1637_s4 + $0x98] sm:$0xff]   ;;  %v1274_v20 = vld [vmem:[%s1637_s4 + $0xa0] sm:$0xff]   ;;  %v1278_v24 = vld [vmem:[%s1637_s4 + $0xa8] sm:$0xff]  }
   0x9   :  { %1122 = vmatpush3.bf16.msra.mxu1 %v1262_v8  ;;  %1101 = vmatprep.subr.bf16.mxu0 %v1263_v9  ;;  %v1279_v25 = vld [vmem:[%s1637_s4 + $0x70] sm:$0xff]   ;;  %v1283_v29 = vld [vmem:[%s1637_s4 + $0x78] sm:$0xff]   ;;  %v49_v33 = vld [vmem:[%s1638_s0] sm:$0xff] }
   0xa   :  { %1123 = vmatprep.subr.bf16.mxu1 %v1264_v10  ;;  %v1280_v26 = vld [vmem:[%s1637_s4 + $0xf0] sm:$0xff]   ;;  %v1284_v30 = vld [vmem:[%s1637_s4 + $0xf8] sm:$0xff]   ;;  %v50_v34 = vld [vmem:[%s1638_s0 + $0x8] sm:$0xff]  ;;  %v1008_v36 = vcombine.low %v49_v33, %v49_v33  ;;  %v1009_v37 = vcombine.high %v49_v33, %v49_v33 }
   0xb   :  { %v1281_v27 = vld [vmem:[%s1637_s4 + $0x30] sm:$0xff]   ;;  %v1285_v31 = vld [vmem:[%s1637_s4 + $0x38] sm:$0xff]   ;;  %v413_v35 = vld [vmem:[%s1639_s3] sm:$0xff]  ;;  %v1010_v38 = vcombine.low %v50_v34, %v50_v34  ;;  %v1011_v39 = vcombine.high %v50_v34, %v50_v34 }
   0xc   :  { %1102 = vmatpush3.bf16.msra.mxu0 %v1265_v11  ;;  %v1282_v28 = vld [vmem:[%s1637_s4 + $0xb0] sm:$0xff]   ;;  %v1286_v32 = vld [vmem:[%s1637_s4 + $0xb8] sm:$0xff]   ;;  %v425_v40 = vld [vmem:[%s1640_s7] sm:$0x1]  ;;  %416 = vperm.xlu0 %1254, %v413_v35  }
   0xd   :  { %1124 = vmatpush3.bf16.msra.mxu1 %v1266_v12  ;;  %1103 = vmatprep.subr.bf16.mxu0 %v1267_v13  ;;  %v1058_v41 = vld [vmem:[%s1640_s7 + $0x1] sm:$0x1]  ;;  %v432_v43 = vsel %vm430_vm0, %v425_v40, 0  ;;  %v1292_v48 = vld [vmem:[%s1642_s6 + $0x10] sm:$0xff]   ;;  %v1293_v49 = vld [vmem:[%s1642_s6 + $0x8] sm:$0xff]  }
   0xe   :  { %1125 = vmatprep.subr.bf16.mxu1 %v1268_v14  ;;  %360 = vmatprep.mubr.bf16.mxu0 %v1009_v37  ;;  %v619_v44 = vsel %vm430_vm0, %v1058_v41, 0  ;;  %v410_v45 = vld [vmem:[%s1641_s1] sm:$0xff]  ;;  %v1294_v50 = vld [vmem:[%s1642_s6 + $0x18] sm:$0xff]   ;;  %v1296_v2 = vld [vmem:[%s1643_s8 + $0x10] sm:$0xff]  }
   0xf   :  { %400 = vmatprep.mubr.bf16.mxu1 %v1011_v39  ;;  %v1515_v46 = vpack.c.bf16 %v410_v45, %v410_v45  ;;  %v1291_v47 = vld [vmem:[%s1642_s6] sm:$0xff]   ;;  %v1297_v4 = vld [vmem:[%s1643_s8 + $0x8] sm:$0xff]   ;;  %v1298_v7 = vld [vmem:[%s1643_s8 + $0x18] sm:$0xff]  }
  0x10   :  { %1104 = vmatpush3.bf16.msra.mxu0 %v1269_v15  ;;  %v1007_v53 = vld [vmem:[%s1644_s5] ss:$0 sm:$0xff]  ;;  %v1079_v9 = vld [vmem:[%s1640_s7 + $0x2] sm:$0x1]  ;;  %v1300_v13 = vld [vmem:[%s1642_s6 + $0x28] sm:$0xff]  }
  0x11   :  { %1126 = vmatpush3.bf16.msra.mxu1 %v1270_v16  ;;  %1105 = vmatprep.subr.bf16.mxu0 %v1271_v17  ;;  %v1295_v1 = vld [vmem:[%s1643_s8] sm:$0xff]   ;;  %v802_v12 = vsel %vm430_vm0, %v1079_v9, 0  ;;  %v1302_v15 = vld [vmem:[%s1643_s8 + $0x28] sm:$0xff]   ;;  %v20_v16 = vstv %s1646_s12 }
  0x12   :  { %1127 = vmatprep.subr.bf16.mxu1 %v1272_v18  ;;  %v412_v6 = vld [vmem:[%s1645_s2] sm:$0xff]  ;;  %21 = vst [vmem:[#allocation2] sm:$0x1] %v20_v16 }
  0x13   :  { %v1299_v11 = vld [vmem:[%s1642_s6 + $0x20] sm:$0xff]  }
  0x14   :  { %1106 = vmatpush3.bf16.msra.mxu0 %v1273_v19  ;;  %v1301_v14 = vld [vmem:[%s1643_s8 + $0x20] sm:$0xff]  }
  0x15   :  { %1128 = vmatpush3.bf16.msra.mxu1 %v1274_v20  ;;  %1107 = vmatprep.subr.bf16.mxu0 %v1275_v21  ;;  %v1048_v17 = vld [vmem:[%s1647_s9] ss:$0 sm:$0xff]  ;;  %v1064_v20 = vld [vmem:[%s1647_s9 + $0x1] ss:$0 sm:$0xff] }
  0x16   :  { %1129 = vmatprep.subr.bf16.mxu1 %v1276_v22  ;;  %v1049_v18 = vld [vmem:[%s1648_s10] ss:$0 sm:$0xff]  ;;  %v1070_v21 = vld [vmem:[%s1648_s10 + $0x1] ss:$0 sm:$0xff] }
  0x17   :  { %v1231_v19 = vadd.f32 %v1049_v18, %v1048_v17 }
  0x18   :  { %1108 = vmatpush3.bf16.msra.mxu0 %v1277_v23 }
  0x19   :  { %1130 = vmatpush3.bf16.msra.mxu1 %v1278_v24  ;;  %1109 = vmatprep.subr.bf16.mxu0 %v1279_v25  ;;  %v1233_v24 = vadd.f32 %v1070_v21, %v1064_v20 }
  0x1a   :  { %1131 = vmatprep.subr.bf16.mxu1 %v1280_v26 }
  0x1c   :  { %1110 = vmatpush3.bf16.msra.mxu0 %v1281_v27 }
  0x1d   :  { %1132 = vmatpush3.bf16.msra.mxu1 %v1282_v28  ;;  %1111 = vmatprep.subr.bf16.mxu0 %v1283_v29 }
  0x1e   :  { %1133 = vmatprep.subr.bf16.mxu1 %v1284_v30 }
  0x20   :  { %1112 = vmatpush3.bf16.msra.mxu0 %v1285_v31 }
  0x21   :  { %1134 = vmatpush3.bf16.msra.mxu1 %v1286_v32  ;;  %1165 = vmatprep.subr.bf16.mxu0 %v1314_v42 }
  0x22   :  { %1187 = vmatprep.subr.bf16.mxu1 %v1314_v42 }
  0x23   :  { %361 = vmatmul.mubr.bf16.vlgmr.msra.gmra.mrb[0].mxu0 %v1008_v36 }
  0x24   :  { %401 = vmatmul.mubr.bf16.vlgmr.msra.gmra.mrb[0].mxu1 %v1010_v38  ;;  %1166 = vmatpush3.bf16.msra.mxu0 %v432_v43 }
  0x25   :  { %1188 = vmatpush3.bf16.msra.mxu1 %v619_v44  ;;  %1167 = vmatprep.mubr.msk.bf16.mxu0 %vm1315_vm1, %v1314_v42 }
  0x26   :  { %1171 = vmatprep.subr.bf16.mxu0 %v1314_v42  ;;  %1189 = vmatprep.mubr.msk.bf16.mxu1 %vm1315_vm1, %v1314_v42 }
  0x27   :  { %1193 = vmatprep.subr.bf16.mxu1 %v1314_v42 }
  0x2b   :  { %1168 = vmatmul.mubr.msk.bf16.vlgmr.msra.gmra.mrb[4].mxu0 %vm426_vm2, %v1515_v46 }
  0x2c   :  { %1190 = vmatmul.mubr.msk.bf16.vlgmr.msra.gmra.mrb[4].mxu1 %vm426_vm2, %v1515_v46  ;;  %1175 = vmatprep.mubr.msk.bf16.mxu0 %vm1315_vm1, %v1314_v42 }
  0x2d   :  { %1197 = vmatprep.mubr.msk.bf16.mxu1 %vm1315_vm1, %v1314_v42  ;;  %1172 = vmatpush3.bf16.msra.mxu0 %v1291_v47 }
  0x2e   :  { %1173 = vmatprep.subr.bf16.mxu0 %v1314_v42  ;;  %1194 = vmatpush3.bf16.msra.mxu1 %v1292_v48 }
  0x2f   :  { %1195 = vmatprep.subr.bf16.mxu1 %v1314_v42 }
  0x31   :  { %1174 = vmatpush3.bf16.msra.mxu0 %v1293_v49 }
  0x32   :  { %1196 = vmatpush3.bf16.msra.mxu1 %v1294_v50  ;;  %1179 = vmatprep.subr.bf16.mxu0 %v1314_v42 }
  0x33   :  { %1201 = vmatprep.subr.bf16.mxu1 %v1314_v42 }
  0x8b   :  { %v417_v5 = vpop.permute.xlu0 %416 }
  0x8c   :  { %v1567_v8 = vmul.f32 %v417_v5, %v412_v6 }
  0x8e   :  { %v420_v10 = vpack.c.bf16 %v1567_v8, %v1567_v8 }
  0xf6   :  { %v1113_v51 = vpop.f32.mrb[0].mxu0 }
  0xf7   :  { %v1135_v52 = vpop.f32.mrb[0].mxu1  ;;  %v1114_v54 = vpop.f32.mrb[1].mxu0 }
  0xf8   :  { %v1136_v55 = vpop.f32.mrb[1].mxu1  ;;  %v1115_v56 = vadd.f32 %v1114_v54, %v1113_v51  ;;  %v1116_v58 = vpop.f32.mrb[2].mxu0  ;;  %v1091_v51 = vld [vmem:[%s1648_s10 + $0x2] ss:$0 sm:$0xff] }
  0xf9   :  { %v1137_v57 = vadd.f32 %v1136_v55, %v1135_v52  ;;  %v1138_v59 = vpop.f32.mrb[2].mxu1  ;;  %v1117_v60 = vpop.f32.mrb[3].mxu0 }
  0xfa   :  { %v1139_v61 = vpop.f32.mrb[3].mxu1  ;;  %v363_v62 = vadd.f32 %v1115_v56, %v1007_v53  ;;  %v1085_v53 = vld [vmem:[%s1647_s9 + $0x2] ss:$0 sm:$0xff] }
  0xfc   :  { %v403_v63 = vadd.f32 %v1137_v57, %v363_v62 }
  0xfe   :  { %v408_v0 = vmax.f32 %v403_v63, 0.0 }
 0x100   :  { %v409_v3 = vpack.c.bf16 %v408_v0, %v408_v0  ;;  %v1095_v0 = vld [vmem:[%s1649_s11] ss:$0 sm:$0xff] }
 0x102   :  { %1176 = vmatmul.mubr.msk.bf16.vlgmr.msra.gmra.mrb[4].mxu0 %vm486_vm3, %v409_v3  ;;  %1198 = vmatmul.mubr.msk.bf16.vlgmr.msra.gmra.mrb[4].mxu1 %vm486_vm3, %v409_v3 }
 0x103   :  { %1180 = vmatpush3.bf16.msra.mxu0 %v1295_v1  ;;  %1202 = vmatpush3.bf16.msra.mxu1 %v1296_v2 }
 0x104   :  { %1181 = vmatprep.subr.bf16.mxu0 %v1314_v42  ;;  %1203 = vmatprep.subr.bf16.mxu1 %v1314_v42 }
 0x105   :  { %1183 = vmatprep.mubr.msk.bf16.mxu0 %vm1315_vm1, %v1314_v42  ;;  %1205 = vmatprep.mubr.msk.bf16.mxu1 %vm1315_vm1, %v1314_v42 }
 0x107   :  { %1182 = vmatpush3.bf16.msra.mxu0 %v1297_v4  ;;  %1204 = vmatpush3.bf16.msra.mxu1 %v1298_v7  ;;  %v1096_v4 = vld [vmem:[#allocation2] ss:$0 sm:$0xff] }
 0x108   :  { %1215 = vmatprep.subr.bf16.mxu1 %v1314_v42  ;;  %1209 = vmatprep.subr.bf16.mxu0 %v1314_v42 }
 0x10e   :  { %1184 = vmatmul.mubr.msk.bf16.vlgmr.msra.gmra.mrb[4].mxu0 %vm486_vm3, %v420_v10  ;;  %1206 = vmatmul.mubr.msk.bf16.vlgmr.msra.gmra.mrb[4].mxu1 %vm486_vm3, %v420_v10 }
 0x10f   :  { %1216 = vmatpush3.bf16.msra.mxu1 %v1299_v11  ;;  %1210 = vmatpush3.bf16.msra.mxu0 %v802_v12 }
 0x110   :  { %1217 = vmatprep.subr.bf16.mxu1 %v1314_v42  ;;  %1211 = vmatprep.mubr.msk.bf16.mxu0 %vm1315_vm1, %v1314_v42 }
 0x111   :  { %1219 = vmatprep.mubr.msk.bf16.mxu1 %vm1315_vm1, %v1314_v42  ;;  %1223 = vmatprep.subr.bf16.mxu0 %v1314_v42 }
 0x113   :  { %1218 = vmatpush3.bf16.msra.mxu1 %v1300_v13 }
 0x116   :  { %1212 = vmatmul.mubr.msk.bf16.vlgmr.msra.gmra.mrb[8].mxu0 %vm426_vm2, %v1515_v46  ;;  %1220 = vmatmul.mubr.msk.bf16.vlgmr.msra.gmra.mrb[8].mxu1 %vm486_vm3, %v409_v3 }
 0x117   :  { %1224 = vmatpush3.bf16.msra.mxu0 %v1301_v14  ;;  %1227 = vmatprep.mubr.msk.bf16.mxu0 %vm1315_vm1, %v1314_v42 }
 0x118   :  { %1225 = vmatprep.subr.bf16.mxu0 %v1314_v42 }
 0x11b   :  { %1226 = vmatpush3.bf16.msra.mxu0 %v1302_v15 }
 0x11e   :  { %1228 = vmatmul.mubr.msk.bf16.vlgmr.msra.gmra.mrb[12].mxu0 %vm486_vm3, %v420_v10 }
 0x1e1   :  { %v598_v22 = vpop.f32.mrb[4].mxu0  ;;  %v781_v23 = vpop.f32.mrb[4].mxu1 }
 0x1e2   :  { %v1232_v25 = vadd.f32 %v1231_v19, %v598_v22  ;;  %v1185_v26 = vpop.f32.mrb[5].mxu0  ;;  %v1207_v27 = vpop.f32.mrb[5].mxu1  ;;  %v1234_v33 = vadd.f32 %v1233_v24, %v781_v23 }
 0x1e3   :  { %v601_v28 = vpop.f32.mrb[6].mxu0  ;;  %v784_v29 = vpop.f32.mrb[6].mxu1 }
 0x1e4   :  { %v1053_v30 = vmul.f32 -1.442695, %v1232_v25  ;;  %v1186_v31 = vpop.f32.mrb[7].mxu0  ;;  %v1208_v32 = vpop.f32.mrb[7].mxu1  ;;  %v1074_v34 = vmul.f32 -1.442695, %v1234_v33 }
 0x1e6   :  { %1303 = vpow2.f32 %v1053_v30 }
 0x1e7   :  { %1305 = vpow2.f32 %v1074_v34 }
 0x1e9   :  { %v838_v35 = vpop.f32.mrb[8].mxu0  ;;  %v890_v36 = vpop.f32.mrb[8].mxu1 }
 0x1ea   :  { %v891_v37 = vadd.f32 %v890_v36, %v838_v35  ;;  %v1221_v38 = vpop.f32.mrb[9].mxu1  ;;  %v1213_v39 = vpop.f32.mrb[9].mxu0 }
 0x1eb   :  { %v893_v40 = vpop.f32.mrb[10].mxu1  ;;  %v841_v41 = vpop.f32.mrb[10].mxu0 }
 0x1ec   :  { %v1222_v42 = vpop.f32.mrb[11].mxu1  ;;  %v1214_v43 = vpop.f32.mrb[11].mxu0  ;;  %v904_v56 = vadd.f32 %v1085_v53, %v891_v37 }
 0x1f0   :  { %v1304_v44 = vpop.eup %1303 }
 0x1f1   :  { %v608_v45 = vadd.f32 1.0, %v1304_v44  ;;  %v964_v46 = vpop.f32.mrb[12].mxu0  ;;  %v1306_v50 = vpop.eup %1305 }
 0x1f2   :  { %v1229_v47 = vpop.f32.mrb[13].mxu0  ;;  %v791_v52 = vadd.f32 1.0, %v1306_v50  ;;  %v965_v54 = vadd.f32 %v1091_v51, %v964_v46 }
 0x1f3   :  { %1307 = vrcp.f32 %v608_v45  ;;  %v967_v48 = vpop.f32.mrb[14].mxu0 }
 0x1f4   :  { %v1230_v49 = vpop.f32.mrb[15].mxu0  ;;  %1309 = vrcp.f32 %v791_v52 }
 0x1fd   :  { %v1308_v55 = vpop.eup %1307 }
 0x1fe   :  { %v970_v57 = vmul.f32 %v1308_v55, %v965_v54  ;;  %v1310_v59 = vpop.eup %1309 }
 0x1ff   :  { %v973_v60 = vsub.f32 1.0, %v1310_v59  ;;  %v975_v63 = vmul.f32 %v1310_v59, %v1567_v8 }
 0x200   :  { %v971_v58 = vadd.f32 %v970_v57, %v904_v56 }
 0x202   :  { %1311 = vtanh.f32 %v971_v58 }
 0x20c   :  { %v1312_v61 = vpop.eup %1311 }
 0x20d   :  { %v974_v62 = vmul.f32 %v1312_v61, %v973_v60 }
 0x20f   :  { %v976_v1 = vadd.f32 %v975_v63, %v974_v62 }
 0x211   :  { %v985_v2 = vmul.f32 %v1095_v0, %v976_v1  ;;  %977 = vst.msk [vmem:[%s1650_s14] sm:$0xff] %vm486_vm3, %v976_v1 }
 0x213   :  { %v986_v3 = vsel %vm486_vm3, %v985_v2, 0.0 }
 0x214   :  { %987 = vadd.xlane.f32.xlu0 %v986_v3 }
 0x2a1   :  { %v988_v5 = vpop.xlane.xlu0 %987 }
 0x2a2   :  { %v996_v6 = vadd.f32 %v1096_v4, %v988_v5 }
 0x2a4   :  { %998 = vst.msk [vmem:[%s1651_s13] sm:$0xff] %vm997_vm4, %v996_v6 }

</bundles_post_ra>
